<compile_context>
chip_gen: v7x
topology: tpu7x:2x2x1
jax: 0.10.0
libtpu: 0.0.40
codegen_flags: <defaults>
</compile_context>

<pallas_src>
import functools

import jax
import jax.numpy as jnp
from jax.experimental import pallas as pl
from jax.experimental.pallas import tpu as pltpu

LANE = 128


def _round_up(n, m):
    return ((n + m - 1) // m) * m


# ----------------------------- Pallas kernel ------------------------------- #

def fbaseline_kernel(
    x_ref,
    w0_ref, b0_ref,                             # Linear(total_feats -> Hp) with gather folded in
    r1w1_ref, r1b1_ref, r1w2_ref, r1b2_ref,     # FullResLayer 1
    r2w1_ref, r2b1_ref, r2w2_ref, r2b2_ref,     # FullResLayer 2
    r3w1_ref, r3b1_ref, r3w2_ref, r3b2_ref,     # FullResLayer 3
    wo_ref, bo_ref,                             # Linear(Hp -> Op), padded cols have -1e30 bias
    o_ref,
):
    def linear(h, w_ref, b_ref):
        return jnp.dot(h, w_ref[...], preferred_element_type=jnp.float32) + b_ref[...]

    def res_block(h, w1_ref, b1_ref, w2_ref, b2_ref):
        t = jnp.maximum(linear(h, w1_ref, b1_ref), 0.0)   # Linear + ReLU (+Dropout = id)
        t = linear(t, w2_ref, b2_ref)                      # Linear
        return jnp.maximum(t + h, 0.0)                     # residual + ReLU

    x = x_ref[...]                                         # [tb, total_feats] f32
    h = jnp.maximum(linear(x, w0_ref, b0_ref), 0.0)        # input proj + ReLU

    h = res_block(h, r1w1_ref, r1b1_ref, r1w2_ref, r1b2_ref)
    h = res_block(h, r2w1_ref, r2b1_ref, r2w2_ref, r2b2_ref)
    h = res_block(h, r3w1_ref, r3b1_ref, r3w2_ref, r3b2_ref)

    # Output projection + softmax(dim=-1).  Padded logit columns carry -1e30
    # bias so exp() underflows to exactly 0 for them.
    logits = linear(h, wo_ref, bo_ref)                     # [tb, Op]
    m = jnp.max(logits, axis=-1, keepdims=True)
    e = jnp.exp(logits - m)
    s = jnp.sum(e, axis=-1, keepdims=True)
    inv = pl.reciprocal(s, approx=True)                    # EUP vrcp
    inv = inv * (2.0 - s * inv)                            # one Newton step -> ~f32 exact
    o_ref[...] = (e * inv).astype(o_ref.dtype)             # lane-dense store


# ------------------------ host-side packing / wrapper ----------------------- #

def _pack_params(params, x_ids, total_feats):
    """Pad hidden/out dims to 128 lanes and fold the x[:, x_ids] gather into w0."""
    f32 = jnp.float32
    w0 = params["w0"].astype(f32)
    in_dim, H = w0.shape
    out_dim = params["wo"].shape[1]
    Hp = _round_up(H, LANE)
    Op = _round_up(out_dim, LANE)

    # (x[:, x_ids]) @ w0 == x @ w0g  with  w0g[j] = sum_{k: x_ids[k]==j} w0[k]
    w0g = jnp.zeros((total_feats, Hp), f32).at[x_ids, :H].add(w0)
    b0p = jnp.zeros((1, Hp), f32).at[:, :H].set(params["b0"].astype(f32))

    def pad_hh(w, b):
        wp = jnp.zeros((Hp, Hp), f32).at[:H, :H].set(w.astype(f32))
        bp = jnp.zeros((1, Hp), f32).at[:, :H].set(b.astype(f32))
        return wp, bp

    packed = [w0g, b0p]
    for r in (1, 2, 3):
        w1p, b1p = pad_hh(params[f"r{r}w1"], params[f"r{r}b1"])
        w2p, b2p = pad_hh(params[f"r{r}w2"], params[f"r{r}b2"])
        packed += [w1p, b1p, w2p, b2p]

    wop = jnp.zeros((Hp, Op), f32).at[:H, :out_dim].set(params["wo"].astype(f32))
    bop = jnp.full((1, Op), -1e30, f32).at[:, :out_dim].set(params["bo"].astype(f32))
    packed += [wop, bop]
    return packed, Hp, Op, out_dim


def fbaseline_forward(x, x_ids, params, *, tb=128):
    """x: [B, total_feats] float32.  Returns [B, out_dim] softmax probabilities."""
    B, total_feats = x.shape

    # Tile size: multiple of 8, no larger than the padded batch.
    tb = max(8, min(int(tb), _round_up(B, 8)))
    tb = _round_up(tb, 8)
    n_blocks = pl.cdiv(B, tb)
    Bp = n_blocks * tb

    # Pad the batch with zero rows (keeps the tail tile finite / NaN-free).
    if Bp != B:
        x = jnp.pad(x, ((0, Bp - B), (0, 0)))

    weights, Hp, Op, out_dim = _pack_params(params, x_ids, total_feats)

    def full_spec(arr):
        nd = arr.ndim
        # Grid-invariant weight/bias: single full block, same for every step.
        return pl.BlockSpec(arr.shape, lambda i, _nd=nd: (0,) * _nd)

    in_specs = [pl.BlockSpec((tb, total_feats), lambda i: (i, 0))] + [
        full_spec(w) for w in weights
    ]
    out_spec = pl.BlockSpec((tb, Op), lambda i: (i, 0))

    out = pl.pallas_call(
        fbaseline_kernel,
        out_shape=jax.ShapeDtypeStruct((Bp, Op), jnp.float32),
        grid=(n_blocks,),
        in_specs=in_specs,
        out_specs=out_spec,
        compiler_params=pltpu.CompilerParams(
            dimension_semantics=("parallel",),
            vmem_limit_bytes=32 * 1024 * 1024,
        ),
    )(x, *weights)

    return out[:B, :out_dim]


# --------------------------- reference / test glue -------------------------- #

def init_params(key, in_dim, n_hidden, out_dim):
    """Deterministic synthetic parameters (uniform fan-in scaling, like PyTorch)."""
    def lin(key, fan_in, fan_out):
        kw, kb = jax.random.split(key)
        bound = 1.0 / jnp.sqrt(fan_in)
        w = jax.random.uniform(kw, (fan_in, fan_out), jnp.float32, -bound, bound)
        b = jax.random.uniform(kb, (1, fan_out), jnp.float32, -bound, bound)
        return w, b

    keys = jax.random.split(key, 8)
    p = {}
    p["w0"], p["b0"] = lin(keys[0], in_dim, n_hidden)
    p["r1w1"], p["r1b1"] = lin(keys[1], n_hidden, n_hidden)
    p["r1w2"], p["r1b2"] = lin(keys[2], n_hidden, n_hidden)
    p["r2w1"], p["r2b1"] = lin(keys[3], n_hidden, n_hidden)
    p["r2w2"], p["r2b2"] = lin(keys[4], n_hidden, n_hidden)
    p["r3w1"], p["r3b1"] = lin(keys[5], n_hidden, n_hidden)
    p["r3w2"], p["r3b2"] = lin(keys[6], n_hidden, n_hidden)
    p["wo"], p["bo"] = lin(keys[7], n_hidden, out_dim)
    return p


def reference_forward(x, x_ids, params):
    """Pure-JAX reference of FBaseline.forward (eval mode)."""
    x = x[:, x_ids]
    h = jax.nn.relu(x @ params["w0"] + params["b0"])

    def res(h, w1, b1, w2, b2):
        t = jax.nn.relu(h @ w1 + b1)
        t = t @ w2 + b2
        return jax.nn.relu(t + h)

    h = res(h, params["r1w1"], params["r1b1"], params["r1w2"], params["r1b2"])
    h = res(h, params["r2w1"], params["r2b1"], params["r2w2"], params["r2b2"])
    h = res(h, params["r3w1"], params["r3b1"], params["r3w2"], params["r3b2"])
    logits = h @ params["wo"] + params["bo"]
    return jax.nn.softmax(logits, axis=-1)


if __name__ == "__main__":
    key = jax.random.PRNGKey(0)
    k_x, k_p = jax.random.split(key)

    # Shapes consistent with the module: raw input has 40 features, x_ids
    # selects in_dim=32 of them, n_hidden=32, out_dim=3 ("three classes").
    # batch=256 with tb=128 -> 2-step "parallel" grid (pipelined DMA, and both
    # TensorCores busy on v7x).
    batch, total_feats, in_dim, n_hidden, out_dim = 256, 40, 32, 32, 3
    tb = 128

    x = jax.random.normal(k_x, (batch, total_feats), jnp.float32)
    # deterministic feature-index selection (config.x_ids)
    x_ids = jnp.arange(0, total_feats, dtype=jnp.int32)[:in_dim][::-1]

    params = init_params(k_p, in_dim, n_hidden, out_dim)

    fwd = jax.jit(functools.partial(fbaseline_forward, tb=tb))
    out = jax.block_until_ready(fwd(x, x_ids, params))

    ref = reference_forward(x, x_ids, params)
    assert out.shape == (batch, out_dim)
    assert jnp.allclose(out, ref, atol=1e-4, rtol=1e-4), "mismatch vs reference"
    assert jnp.allclose(jnp.sum(out, axis=-1), 1.0, atol=1e-4), "softmax rows != 1"

    print("KERNEL_OK")
</pallas_src>

<mosaic_0001>
module attributes {stable_mosaic.version = 11 : i64} {
  func.func @fbaseline_kernel(%arg0: i32, %arg1: memref<128x40xf32, #tpu.memory_space<vmem>>, %arg2: memref<40x128xf32, #tpu.memory_space<vmem>>, %arg3: memref<1x128xf32, #tpu.memory_space<vmem>>, %arg4: memref<128x128xf32, #tpu.memory_space<vmem>>, %arg5: memref<1x128xf32, #tpu.memory_space<vmem>>, %arg6: memref<128x128xf32, #tpu.memory_space<vmem>>, %arg7: memref<1x128xf32, #tpu.memory_space<vmem>>, %arg8: memref<128x128xf32, #tpu.memory_space<vmem>>, %arg9: memref<1x128xf32, #tpu.memory_space<vmem>>, %arg10: memref<128x128xf32, #tpu.memory_space<vmem>>, %arg11: memref<1x128xf32, #tpu.memory_space<vmem>>, %arg12: memref<128x128xf32, #tpu.memory_space<vmem>>, %arg13: memref<1x128xf32, #tpu.memory_space<vmem>>, %arg14: memref<128x128xf32, #tpu.memory_space<vmem>>, %arg15: memref<1x128xf32, #tpu.memory_space<vmem>>, %arg16: memref<128x128xf32, #tpu.memory_space<vmem>>, %arg17: memref<1x128xf32, #tpu.memory_space<vmem>>, %arg18: memref<128x128xf32, #tpu.memory_space<vmem>>) attributes {dimension_semantics = [#tpu.dimension_semantics<parallel>], iteration_bounds = array<i64: 2>, scalar_prefetch = 0 : i64, scratch_operands = 0 : i64, tpu.core_type = #tpu.core_type<tc>, window_params = [{transform_indices = @transform_0, window_bounds = array<i64: 128, 40>}, {pipeline_mode = #tpu.pipeline_mode<synchronous>, transform_indices = @transform_1, window_bounds = array<i64: 40, 128>}, {pipeline_mode = #tpu.pipeline_mode<synchronous>, transform_indices = @transform_2, window_bounds = array<i64: 1, 128>}, {pipeline_mode = #tpu.pipeline_mode<synchronous>, transform_indices = @transform_3, window_bounds = array<i64: 128, 128>}, {pipeline_mode = #tpu.pipeline_mode<synchronous>, transform_indices = @transform_4, window_bounds = array<i64: 1, 128>}, {pipeline_mode = #tpu.pipeline_mode<synchronous>, transform_indices = @transform_5, window_bounds = array<i64: 128, 128>}, {pipeline_mode = #tpu.pipeline_mode<synchronous>, transform_indices = @transform_6, window_bounds = array<i64: 1, 128>}, {pipeline_mode = #tpu.pipeline_mode<synchronous>, transform_indices = @transform_7, window_bounds = array<i64: 128, 128>}, {pipeline_mode = #tpu.pipeline_mode<synchronous>, transform_indices = @transform_8, window_bounds = array<i64: 1, 128>}, {pipeline_mode = #tpu.pipeline_mode<synchronous>, transform_indices = @transform_9, window_bounds = array<i64: 128, 128>}, {pipeline_mode = #tpu.pipeline_mode<synchronous>, transform_indices = @transform_10, window_bounds = array<i64: 1, 128>}, {pipeline_mode = #tpu.pipeline_mode<synchronous>, transform_indices = @transform_11, window_bounds = array<i64: 128, 128>}, {pipeline_mode = #tpu.pipeline_mode<synchronous>, transform_indices = @transform_12, window_bounds = array<i64: 1, 128>}, {pipeline_mode = #tpu.pipeline_mode<synchronous>, transform_indices = @transform_13, window_bounds = array<i64: 128, 128>}, {pipeline_mode = #tpu.pipeline_mode<synchronous>, transform_indices = @transform_14, window_bounds = array<i64: 1, 128>}, {pipeline_mode = #tpu.pipeline_mode<synchronous>, transform_indices = @transform_15, window_bounds = array<i64: 128, 128>}, {pipeline_mode = #tpu.pipeline_mode<synchronous>, transform_indices = @transform_16, window_bounds = array<i64: 1, 128>}, {transform_indices = @transform_17, window_bounds = array<i64: 128, 128>}]} {
    %c0 = arith.constant 0 : index
    %c0_0 = arith.constant 0 : index
    %0 = vector.load %arg1[%c0, %c0_0] : memref<128x40xf32, #tpu.memory_space<vmem>>, vector<128x40xf32>
    %c0_1 = arith.constant 0 : index
    %c0_2 = arith.constant 0 : index
    %1 = vector.load %arg2[%c0_1, %c0_2] : memref<40x128xf32, #tpu.memory_space<vmem>>, vector<40x128xf32>
    %cst = arith.constant dense<0.000000e+00> : vector<128x128xf32>
    %2 = tpu.matmul %0, %1, %cst {dimension_numbers = #tpu.dot_dimension_numbers<[1], [0], [0], [1], [0, 0, 1, 1], [], []>} : vector<128x40xf32>, vector<40x128xf32>, vector<128x128xf32> -> vector<128x128xf32>
    %c0_3 = arith.constant 0 : index
    %c0_4 = arith.constant 0 : index
    %3 = vector.load %arg3[%c0_3, %c0_4] : memref<1x128xf32, #tpu.memory_space<vmem>>, vector<1x128xf32>
    %4 = vector.broadcast %3 : vector<1x128xf32> to vector<128x128xf32>
    %5 = arith.addf %2, %4 : vector<128x128xf32>
    %cst_5 = arith.constant 0.000000e+00 : f32
    %6 = vector.broadcast %cst_5 : f32 to vector<128x128xf32>
    %7 = arith.maximumf %5, %6 : vector<128x128xf32>
    %c0_6 = arith.constant 0 : index
    %c0_7 = arith.constant 0 : index
    %8 = vector.load %arg4[%c0_6, %c0_7] : memref<128x128xf32, #tpu.memory_space<vmem>>, vector<128x128xf32>
    %cst_8 = arith.constant dense<0.000000e+00> : vector<128x128xf32>
    %9 = tpu.matmul %7, %8, %cst_8 {dimension_numbers = #tpu.dot_dimension_numbers<[1], [0], [0], [1], [0, 0, 1, 1], [], []>} : vector<128x128xf32>, vector<128x128xf32>, vector<128x128xf32> -> vector<128x128xf32>
    %c0_9 = arith.constant 0 : index
    %c0_10 = arith.constant 0 : index
    %10 = vector.load %arg5[%c0_9, %c0_10] : memref<1x128xf32, #tpu.memory_space<vmem>>, vector<1x128xf32>
    %11 = vector.broadcast %10 : vector<1x128xf32> to vector<128x128xf32>
    %12 = arith.addf %9, %11 : vector<128x128xf32>
    %cst_11 = arith.constant 0.000000e+00 : f32
    %13 = vector.broadcast %cst_11 : f32 to vector<128x128xf32>
    %14 = arith.maximumf %12, %13 : vector<128x128xf32>
    %c0_12 = arith.constant 0 : index
    %c0_13 = arith.constant 0 : index
    %15 = vector.load %arg6[%c0_12, %c0_13] : memref<128x128xf32, #tpu.memory_space<vmem>>, vector<128x128xf32>
    %cst_14 = arith.constant dense<0.000000e+00> : vector<128x128xf32>
    %16 = tpu.matmul %14, %15, %cst_14 {dimension_numbers = #tpu.dot_dimension_numbers<[1], [0], [0], [1], [0, 0, 1, 1], [], []>} : vector<128x128xf32>, vector<128x128xf32>, vector<128x128xf32> -> vector<128x128xf32>
    %c0_15 = arith.constant 0 : index
    %c0_16 = arith.constant 0 : index
    %17 = vector.load %arg7[%c0_15, %c0_16] : memref<1x128xf32, #tpu.memory_space<vmem>>, vector<1x128xf32>
    %18 = vector.broadcast %17 : vector<1x128xf32> to vector<128x128xf32>
    %19 = arith.addf %16, %18 : vector<128x128xf32>
    %20 = arith.addf %19, %7 : vector<128x128xf32>
    %cst_17 = arith.constant 0.000000e+00 : f32
    %21 = vector.broadcast %cst_17 : f32 to vector<128x128xf32>
    %22 = arith.maximumf %20, %21 : vector<128x128xf32>
    %c0_18 = arith.constant 0 : index
    %c0_19 = arith.constant 0 : index
    %23 = vector.load %arg8[%c0_18, %c0_19] : memref<128x128xf32, #tpu.memory_space<vmem>>, vector<128x128xf32>
    %cst_20 = arith.constant dense<0.000000e+00> : vector<128x128xf32>
    %24 = tpu.matmul %22, %23, %cst_20 {dimension_numbers = #tpu.dot_dimension_numbers<[1], [0], [0], [1], [0, 0, 1, 1], [], []>} : vector<128x128xf32>, vector<128x128xf32>, vector<128x128xf32> -> vector<128x128xf32>
    %c0_21 = arith.constant 0 : index
    %c0_22 = arith.constant 0 : index
    %25 = vector.load %arg9[%c0_21, %c0_22] : memref<1x128xf32, #tpu.memory_space<vmem>>, vector<1x128xf32>
    %26 = vector.broadcast %25 : vector<1x128xf32> to vector<128x128xf32>
    %27 = arith.addf %24, %26 : vector<128x128xf32>
    %cst_23 = arith.constant 0.000000e+00 : f32
    %28 = vector.broadcast %cst_23 : f32 to vector<128x128xf32>
    %29 = arith.maximumf %27, %28 : vector<128x128xf32>
    %c0_24 = arith.constant 0 : index
    %c0_25 = arith.constant 0 : index
    %30 = vector.load %arg10[%c0_24, %c0_25] : memref<128x128xf32, #tpu.memory_space<vmem>>, vector<128x128xf32>
    %cst_26 = arith.constant dense<0.000000e+00> : vector<128x128xf32>
    %31 = tpu.matmul %29, %30, %cst_26 {dimension_numbers = #tpu.dot_dimension_numbers<[1], [0], [0], [1], [0, 0, 1, 1], [], []>} : vector<128x128xf32>, vector<128x128xf32>, vector<128x128xf32> -> vector<128x128xf32>
    %c0_27 = arith.constant 0 : index
    %c0_28 = arith.constant 0 : index
    %32 = vector.load %arg11[%c0_27, %c0_28] : memref<1x128xf32, #tpu.memory_space<vmem>>, vector<1x128xf32>
    %33 = vector.broadcast %32 : vector<1x128xf32> to vector<128x128xf32>
    %34 = arith.addf %31, %33 : vector<128x128xf32>
    %35 = arith.addf %34, %22 : vector<128x128xf32>
    %cst_29 = arith.constant 0.000000e+00 : f32
    %36 = vector.broadcast %cst_29 : f32 to vector<128x128xf32>
    %37 = arith.maximumf %35, %36 : vector<128x128xf32>
    %c0_30 = arith.constant 0 : index
    %c0_31 = arith.constant 0 : index
    %38 = vector.load %arg12[%c0_30, %c0_31] : memref<128x128xf32, #tpu.memory_space<vmem>>, vector<128x128xf32>
    %cst_32 = arith.constant dense<0.000000e+00> : vector<128x128xf32>
    %39 = tpu.matmul %37, %38, %cst_32 {dimension_numbers = #tpu.dot_dimension_numbers<[1], [0], [0], [1], [0, 0, 1, 1], [], []>} : vector<128x128xf32>, vector<128x128xf32>, vector<128x128xf32> -> vector<128x128xf32>
    %c0_33 = arith.constant 0 : index
    %c0_34 = arith.constant 0 : index
    %40 = vector.load %arg13[%c0_33, %c0_34] : memref<1x128xf32, #tpu.memory_space<vmem>>, vector<1x128xf32>
    %41 = vector.broadcast %40 : vector<1x128xf32> to vector<128x128xf32>
    %42 = arith.addf %39, %41 : vector<128x128xf32>
    %cst_35 = arith.constant 0.000000e+00 : f32
    %43 = vector.broadcast %cst_35 : f32 to vector<128x128xf32>
    %44 = arith.maximumf %42, %43 : vector<128x128xf32>
    %c0_36 = arith.constant 0 : index
    %c0_37 = arith.constant 0 : index
    %45 = vector.load %arg14[%c0_36, %c0_37] : memref<128x128xf32, #tpu.memory_space<vmem>>, vector<128x128xf32>
    %cst_38 = arith.constant dense<0.000000e+00> : vector<128x128xf32>
    %46 = tpu.matmul %44, %45, %cst_38 {dimension_numbers = #tpu.dot_dimension_numbers<[1], [0], [0], [1], [0, 0, 1, 1], [], []>} : vector<128x128xf32>, vector<128x128xf32>, vector<128x128xf32> -> vector<128x128xf32>
    %c0_39 = arith.constant 0 : index
    %c0_40 = arith.constant 0 : index
    %47 = vector.load %arg15[%c0_39, %c0_40] : memref<1x128xf32, #tpu.memory_space<vmem>>, vector<1x128xf32>
    %48 = vector.broadcast %47 : vector<1x128xf32> to vector<128x128xf32>
    %49 = arith.addf %46, %48 : vector<128x128xf32>
    %50 = arith.addf %49, %37 : vector<128x128xf32>
    %cst_41 = arith.constant 0.000000e+00 : f32
    %51 = vector.broadcast %cst_41 : f32 to vector<128x128xf32>
    %52 = arith.maximumf %50, %51 : vector<128x128xf32>
    %c0_42 = arith.constant 0 : index
    %c0_43 = arith.constant 0 : index
    %53 = vector.load %arg16[%c0_42, %c0_43] : memref<128x128xf32, #tpu.memory_space<vmem>>, vector<128x128xf32>
    %cst_44 = arith.constant dense<0.000000e+00> : vector<128x128xf32>
    %54 = tpu.matmul %52, %53, %cst_44 {dimension_numbers = #tpu.dot_dimension_numbers<[1], [0], [0], [1], [0, 0, 1, 1], [], []>} : vector<128x128xf32>, vector<128x128xf32>, vector<128x128xf32> -> vector<128x128xf32>
    %c0_45 = arith.constant 0 : index
    %c0_46 = arith.constant 0 : index
    %55 = vector.load %arg17[%c0_45, %c0_46] : memref<1x128xf32, #tpu.memory_space<vmem>>, vector<1x128xf32>
    %56 = vector.broadcast %55 : vector<1x128xf32> to vector<128x128xf32>
    %57 = arith.addf %54, %56 : vector<128x128xf32>
    %cst_47 = arith.constant dense<0xFF800000> : vector<128xf32>
    %58 = vector.multi_reduction <maximumf>, %57, %cst_47 [1] : vector<128x128xf32> to vector<128xf32>
    %59 = vector.shape_cast %58 : vector<128xf32> to vector<128x1xf32>
    %60 = vector.broadcast %59 : vector<128x1xf32> to vector<128x128xf32>
    %61 = arith.subf %57, %60 : vector<128x128xf32>
    %62 = math.exp %61 : vector<128x128xf32>
    %cst_48 = arith.constant dense<0.000000e+00> : vector<128xf32>
    %63 = vector.multi_reduction <add>, %62, %cst_48 [1] : vector<128x128xf32> to vector<128xf32>
    %64 = vector.shape_cast %63 : vector<128xf32> to vector<128x1xf32>
    %65 = tpu.reciprocal %64 {approx = true} : vector<128x1xf32> -> vector<128x1xf32>
    %66 = arith.mulf %64, %65 : vector<128x1xf32>
    %cst_49 = arith.constant 2.000000e+00 : f32
    %67 = vector.broadcast %cst_49 : f32 to vector<128x1xf32>
    %68 = arith.subf %67, %66 : vector<128x1xf32>
    %69 = arith.mulf %65, %68 : vector<128x1xf32>
    %70 = vector.broadcast %69 : vector<128x1xf32> to vector<128x128xf32>
    %71 = arith.mulf %62, %70 : vector<128x128xf32>
    %c0_50 = arith.constant 0 : index
    %c0_51 = arith.constant 0 : index
    %72 = vector.load %arg18[%c0_50, %c0_51] : memref<128x128xf32, #tpu.memory_space<vmem>>, vector<128x128xf32>
    tpu.vector_store %arg18[%c0_50, %c0_51], %71 {strides = array<i32>} : memref<128x128xf32, #tpu.memory_space<vmem>>, vector<128x128xf32>,
    return
  }
  func.func @transform_0(%arg0: i32) -> (i32, i32) {
    %c0_i32 = arith.constant 0 : i32
    %c0_i32_0 = arith.constant 0 : i32
    return %arg0, %c0_i32 : i32, i32
  }
  func.func @transform_1(%arg0: i32) -> (i32, i32) {
    %c0_i32 = arith.constant 0 : i32
    %c0_i32_0 = arith.constant 0 : i32
    %c0_i32_1 = arith.constant 0 : i32
    return %c0_i32, %c0_i32_0 : i32, i32
  }
  func.func @transform_2(%arg0: i32) -> (i32, i32) {
    %c0_i32 = arith.constant 0 : i32
    %c0_i32_0 = arith.constant 0 : i32
    %c0_i32_1 = arith.constant 0 : i32
    return %c0_i32, %c0_i32_0 : i32, i32
  }
  func.func @transform_3(%arg0: i32) -> (i32, i32) {
    %c0_i32 = arith.constant 0 : i32
    %c0_i32_0 = arith.constant 0 : i32
    %c0_i32_1 = arith.constant 0 : i32
    return %c0_i32, %c0_i32_0 : i32, i32
  }
  func.func @transform_4(%arg0: i32) -> (i32, i32) {
    %c0_i32 = arith.constant 0 : i32
    %c0_i32_0 = arith.constant 0 : i32
    %c0_i32_1 = arith.constant 0 : i32
    return %c0_i32, %c0_i32_0 : i32, i32
  }
  func.func @transform_5(%arg0: i32) -> (i32, i32) {
    %c0_i32 = arith.constant 0 : i32
    %c0_i32_0 = arith.constant 0 : i32
    %c0_i32_1 = arith.constant 0 : i32
    return %c0_i32, %c0_i32_0 : i32, i32
  }
  func.func @transform_6(%arg0: i32) -> (i32, i32) {
    %c0_i32 = arith.constant 0 : i32
    %c0_i32_0 = arith.constant 0 : i32
    %c0_i32_1 = arith.constant 0 : i32
    return %c0_i32, %c0_i32_0 : i32, i32
  }
  func.func @transform_7(%arg0: i32) -> (i32, i32) {
    %c0_i32 = arith.constant 0 : i32
    %c0_i32_0 = arith.constant 0 : i32
    %c0_i32_1 = arith.constant 0 : i32
    return %c0_i32, %c0_i32_0 : i32, i32
  }
  func.func @transform_8(%arg0: i32) -> (i32, i32) {
    %c0_i32 = arith.constant 0 : i32
    %c0_i32_0 = arith.constant 0 : i32
    %c0_i32_1 = arith.constant 0 : i32
    return %c0_i32, %c0_i32_0 : i32, i32
  }
  func.func @transform_9(%arg0: i32) -> (i32, i32) {
    %c0_i32 = arith.constant 0 : i32
    %c0_i32_0 = arith.constant 0 : i32
    %c0_i32_1 = arith.constant 0 : i32
    return %c0_i32, %c0_i32_0 : i32, i32
  }
  func.func @transform_10(%arg0: i32) -> (i32, i32) {
    %c0_i32 = arith.constant 0 : i32
    %c0_i32_0 = arith.constant 0 : i32
    %c0_i32_1 = arith.constant 0 : i32
    return %c0_i32, %c0_i32_0 : i32, i32
  }
  func.func @transform_11(%arg0: i32) -> (i32, i32) {
    %c0_i32 = arith.constant 0 : i32
    %c0_i32_0 = arith.constant 0 : i32
    %c0_i32_1 = arith.constant 0 : i32
    return %c0_i32, %c0_i32_0 : i32, i32
  }
  func.func @transform_12(%arg0: i32) -> (i32, i32) {
    %c0_i32 = arith.constant 0 : i32
    %c0_i32_0 = arith.constant 0 : i32
    %c0_i32_1 = arith.constant 0 : i32
    return %c0_i32, %c0_i32_0 : i32, i32
  }
  func.func @transform_13(%arg0: i32) -> (i32, i32) {
    %c0_i32 = arith.constant 0 : i32
    %c0_i32_0 = arith.constant 0 : i32
    %c0_i32_1 = arith.constant 0 : i32
    return %c0_i32, %c0_i32_0 : i32, i32
  }
  func.func @transform_14(%arg0: i32) -> (i32, i32) {
    %c0_i32 = arith.constant 0 : i32
    %c0_i32_0 = arith.constant 0 : i32
    %c0_i32_1 = arith.constant 0 : i32
    return %c0_i32, %c0_i32_0 : i32, i32
  }
  func.func @transform_15(%arg0: i32) -> (i32, i32) {
    %c0_i32 = arith.constant 0 : i32
    %c0_i32_0 = arith.constant 0 : i32
    %c0_i32_1 = arith.constant 0 : i32
    return %c0_i32, %c0_i32_0 : i32, i32
  }
  func.func @transform_16(%arg0: i32) -> (i32, i32) {
    %c0_i32 = arith.constant 0 : i32
    %c0_i32_0 = arith.constant 0 : i32
    %c0_i32_1 = arith.constant 0 : i32
    return %c0_i32, %c0_i32_0 : i32, i32
  }
  func.func @transform_17(%arg0: i32) -> (i32, i32) {
    %c0_i32 = arith.constant 0 : i32
    %c0_i32_0 = arith.constant 0 : i32
    return %arg0, %c0_i32 : i32, i32
  }
}

</mosaic_0001>

<bundles_post_ra>
// kernel: fbaseline_forward.1
= control target key start
LH: loop header
LB: loop body
LE: loop exit
PB: predicated region body
PF: predicated region fallthrough
CT: control target
= control target key end

     0   :  { %s3498_s24 = smov 0   ;;  %s4465_s0 = inlined_call_operand.vmem [shape: f32[256,40], index: 0, kind: input, shape index: {}]   ;;  %s4466_s1 = inlined_call_operand.vmem [shape: f32[40,128], index: 1, kind: input, shape index: {}]   ;;  %s4467_s2 = inlined_call_operand.vmem [shape: f32[1,128], index: 2, kind: input, shape index: {}]   ;;  %s4468_s3 = inlined_call_operand.vmem [shape: f32[128,128], index: 3, kind: input, shape index: {}]   ;;  %s4469_s4 = inlined_call_operand.vmem [shape: f32[1,128], index: 4, kind: input, shape index: {}]   ;;  %s4470_s5 = inlined_call_operand.vmem [shape: f32[128,128], index: 5, kind: input, shape index: {}]   ;;  %s4471_s6 = inlined_call_operand.vmem [shape: f32[1,128], index: 6, kind: input, shape index: {}]   ;;  %s4472_s7 = inlined_call_operand.vmem [shape: f32[128,128], index: 7, kind: input, shape index: {}]   ;;  %s4473_s8 = inlined_call_operand.vmem [shape: f32[1,128], index: 8, kind: input, shape index: {}]   ;;  %s4474_s9 = inlined_call_operand.vmem [shape: f32[128,128], index: 9, kind: input, shape index: {}]   ;;  %s4475_s10 = inlined_call_operand.vmem [shape: f32[1,128], index: 10, kind: input, shape index: {}]   ;;  %s4476_s11 = inlined_call_operand.vmem [shape: f32[128,128], index: 11, kind: input, shape index: {}]   ;;  %s4477_s12 = inlined_call_operand.vmem [shape: f32[1,128], index: 12, kind: input, shape index: {}]   ;;  %s4478_s13 = inlined_call_operand.vmem [shape: f32[128,128], index: 13, kind: input, shape index: {}]   ;;  %s4479_s14 = inlined_call_operand.vmem [shape: f32[1,128], index: 14, kind: input, shape index: {}]   ;;  %s4480_s15 = inlined_call_operand.vmem [shape: f32[128,128], index: 15, kind: input, shape index: {}]   ;;  %s4481_s16 = inlined_call_operand.vmem [shape: f32[1,128], index: 16, kind: input, shape index: {}]   ;;  %s4482_s17 = inlined_call_operand.vmem [shape: f32[256,128], index: 17, kind: output, shape index: {}]  }
   0x1   :  { %4484 = sst [smem:[#allocation2_spill]] %s4465_s0 }
   0x2   :  { %4485 = sst [smem:[#allocation3_spill]] %s4466_s1 }
   0x3 LB: > { %s2374_s25 = sadd.s32 4294967295, %s3406_s24   ;;  %p2378_p0 = scmp.ge.s32.totalorder %s3406_s24, 1  ;;  %s3406_s24 = sphi %s3498_s24, %s27_s24  }
   0x4   : > { %p488_p1 = scmp.lt.s32.totalorder %s3406_s24, 3 }
   0x6   : > { %p489_p2 = pnand %p2378_p0, %p488_p1 }
   0x7   : > { %s4486_s28 = sld [smem:[#allocation3_spill]] (!%p489_p2)  ;;  %s2379_s19 = sshll.u32 (!%p489_p2), %s2374_s25, 4  ;;  %v790_v5 = vld [vmem:[%s4468_s3] sm:$0xff] (!%p489_p2)  ;;  %v791_v7 = vld [vmem:[%s4468_s3 + $0x8] sm:$0xff] (!%p489_p2)  ;;  %v792_v8 = vld [vmem:[%s4468_s3 + $0x10] sm:$0xff] (!%p489_p2)  ;;  %vm580_vm0 = vcmask (!%p489_p2), 326656  }
   0x8   : > { %492 = sbr.rel (%p489_p2) target bundleno = 2124 (0x84c), region = 88  ;;  %p541_p3 = scmp.lt.s32.totalorder (!%p489_p2), %s2379_s19, 31  ;;  %v793_v9 = vld [vmem:[%s4468_s3 + $0x18] sm:$0xff] (!%p489_p2)  ;;  %v3088_v10 = vpack.c.bf16 (!%p489_p2), %v791_v7, %v790_v5  ;;  %v794_v12 = vld [vmem:[%s4468_s3 + $0x20] sm:$0xff] (!%p489_p2)  ;;  %v795_v13 = vld [vmem:[%s4468_s3 + $0x28] sm:$0xff] (!%p489_p2) }
   0x9   : > { %v3092_v11 = vpack.c.bf16 (!%p489_p2), %v793_v9, %v792_v8  ;;  %s4487_s29 = sld [smem:[#allocation2_spill]] (!%p489_p2)  ;;  %v3096_v16 = vpack.c.bf16 (!%p489_p2), %v795_v13, %v794_v12  ;;  %v796_v17 = vld [vmem:[%s4468_s3 + $0x30] sm:$0xff] (!%p489_p2)  ;;  %v797_v18 = vld [vmem:[%s4468_s3 + $0x38] sm:$0xff] (!%p489_p2)  ;;  %v798_v22 = vld [vmem:[%s4468_s3 + $0x40] sm:$0xff] (!%p489_p2) }
   0xa   : > { %3089 = vmatprep.subr.bf16.mxu1 (!%p489_p2), %v3088_v10  ;;  %v3100_v21 = vpack.c.bf16 (!%p489_p2), %v797_v18, %v796_v17  ;;  %v799_v23 = vld [vmem:[%s4468_s3 + $0x48] sm:$0xff] (!%p489_p2)  ;;  %v800_v27 = vld [vmem:[%s4468_s3 + $0x50] sm:$0xff] (!%p489_p2)  ;;  %v801_v28 = vld [vmem:[%s4468_s3 + $0x58] sm:$0xff] (!%p489_p2) }
   0xb   : > { %3091 = vmatpush3.bf16.msra.mxu1 (!%p489_p2), %v3088_v10  ;;  %v3104_v26 = vpack.c.bf16 (!%p489_p2), %v799_v23, %v798_v22  ;;  %v3108_v31 = vpack.c.bf16 (!%p489_p2), %v801_v28, %v800_v27  ;;  %v802_v32 = vld [vmem:[%s4468_s3 + $0x60] sm:$0xff] (!%p489_p2)  ;;  %v803_v33 = vld [vmem:[%s4468_s3 + $0x68] sm:$0xff] (!%p489_p2)  ;;  %v804_v44 = vld [vmem:[%s4468_s3 + $0x70] sm:$0xff] (!%p489_p2) }
   0xc   : > { %3093 = vmatprep.subr.bf16.mxu1 (!%p489_p2), %v3092_v11  ;;  %v3112_v36 = vpack.c.bf16 (!%p489_p2), %v803_v33, %v802_v32  ;;  %v805_v45 = vld [vmem:[%s4468_s3 + $0x78] sm:$0xff] (!%p489_p2)  ;;  %v974_v47 = vld [vmem:[%s4470_s5] sm:$0xff] (!%p489_p2)  ;;  %v975_v48 = vld [vmem:[%s4470_s5 + $0x8] sm:$0xff] (!%p489_p2) }
   0xd   : > { %v568_v0 = vld [vmem:[%s4486_s28] sm:$0xff] (!%p489_p2)  ;;  %v569_v1 = vld [vmem:[%s4486_s28 + $0x8] sm:$0xff] (!%p489_p2)  ;;  %v570_v2 = vld [vmem:[%s4486_s28 + $0x10] sm:$0xff] (!%p489_p2)  ;;  %v3116_v46 = vpack.c.bf16 (!%p489_p2), %v805_v45, %v804_v44  ;;  %v3120_v50 = vpack.c.bf16 (!%p489_p2), %v975_v48, %v974_v47 }
   0xe   : > { %v3080_v3 = vpack.c.bf16 (!%p489_p2), %v569_v1, %v568_v0  ;;  %v571_v4 = vld [vmem:[%s4486_s28 + $0x18] sm:$0xff] (!%p489_p2)  ;;  %v572_v14 = vld [vmem:[%s4486_s28 + $0x20] sm:$0xff] (!%p489_p2)  ;;  %v976_v49 = vld [vmem:[%s4470_s5 + $0x10] sm:$0xff] (!%p489_p2) }
   0xf   : > { %v3084_v6 = vpack.c.bf16 %v571_v4, %v570_v2  ;;  %s4489_s19 = smov (!%p541_p3, %s2379_s19), 31  ;;  %3095 = vmatpush3.bf16.msra.mxu1 %v3092_v11  ;;  %v977_v51 = vld [vmem:[%s4470_s5 + $0x18] sm:$0xff]  ;;  %v978_v53 = vld [vmem:[%s4470_s5 + $0x20] sm:$0xff]  ;;  %v979_v54 = vld [vmem:[%s4470_s5 + $0x28] sm:$0xff] }
  0x10   : > { %3081 = vmatprep.subr.bf16.mxu0 %v3080_v3  ;;  %s2380_s21 = sshll.u32 %s4489_s19, 3  ;;  %3097 = vmatprep.subr.bf16.mxu1 %v3096_v16  ;;  %v3124_v52 = vpack.c.bf16 %v977_v51, %v976_v49  ;;  %v3128_v55 = vpack.c.bf16 %v979_v54, %v978_v53  ;;  %v980_v56 = vld [vmem:[%s4470_s5 + $0x30] sm:$0xff]  ;;  %v981_v57 = vld [vmem:[%s4470_s5 + $0x38] sm:$0xff]  ;;  %v982_v59 = vld [vmem:[%s4470_s5 + $0x40] sm:$0xff] }
  0x11   : > { %3083 = vmatpush3.bf16.msra.mxu0 %v3080_v3  ;;  %s3547_s25 = scalar_lea.vmem %s4487_s29, %s2380_s21  ;;  %v3132_v58 = vpack.c.bf16 %v981_v57, %v980_v56  ;;  %v983_v60 = vld [vmem:[%s4470_s5 + $0x48] sm:$0xff]  ;;  %v984_v62 = vld [vmem:[%s4470_s5 + $0x50] sm:$0xff]  ;;  %v985_v63 = vld [vmem:[%s4470_s5 + $0x58] sm:$0xff]  ;;  %s4428_s30 = scalar_lea.vmem %s4482_s17, %s2380_s21 }
  0x12   : > { %3085 = vmatprep.subr.bf16.mxu0 %v3084_v6  ;;  %v552_v15 = vld [vmem:[%s3547_s25] sm:$0xff]  ;;  %v553_v19 = vld [vmem:[%s3547_s25 + $0x8] sm:$0xff]  ;;  %v554_v20 = vld [vmem:[%s3547_s25 + $0x10] sm:$0xff]  ;;  %v3136_v61 = vpack.c.bf16 %v983_v60, %v982_v59  ;;  %v3140_v0 = vpack.c.bf16 %v985_v63, %v984_v62 }
  0x13   : > { %2664 = vmatprep.mubr.msk.f32.mxu0 %vm580_vm0, %v552_v15  ;;  %v555_v24 = vld [vmem:[%s3547_s25 + $0x18] sm:$0xff]  ;;  %3099 = vmatpush3.bf16.msra.mxu1 %v3096_v16  ;;  %v556_v25 = vld [vmem:[%s3547_s25 + $0x20] sm:$0xff]  ;;  %v557_v29 = vld [vmem:[%s3547_s25 + $0x28] sm:$0xff] }
  0x14   : > { %3101 = vmatprep.subr.bf16.mxu1 %v3100_v21  ;;  %v558_v30 = vld [vmem:[%s3547_s25 + $0x30] sm:$0xff]  ;;  %v559_v34 = vld [vmem:[%s3547_s25 + $0x38] sm:$0xff]  ;;  %v560_v35 = vld [vmem:[%s3547_s25 + $0x40] sm:$0xff] }
  0x15   : > { %3087 = vmatpush3.bf16.msra.mxu0 %v3084_v6  ;;  %v561_v37 = vld [vmem:[%s3547_s25 + $0x48] sm:$0xff]  ;;  %v562_v38 = vld [vmem:[%s3547_s25 + $0x50] sm:$0xff]  ;;  %v563_v39 = vld [vmem:[%s3547_s25 + $0x58] sm:$0xff] }
  0x16   : > { %2662 = vmatprep.subr.mxu0 %v572_v14  ;;  %v564_v40 = vld [vmem:[%s3547_s25 + $0x60] sm:$0xff]  ;;  %v565_v41 = vld [vmem:[%s3547_s25 + $0x68] sm:$0xff]  ;;  %v566_v42 = vld [vmem:[%s3547_s25 + $0x70] sm:$0xff] }
  0x17   : > { %3103 = vmatpush3.bf16.msra.mxu1 %v3100_v21  ;;  %v567_v43 = vld [vmem:[%s3547_s25 + $0x78] sm:$0xff]  ;;  %v986_v1 = vld [vmem:[%s4470_s5 + $0x60] sm:$0xff]  ;;  %v987_v2 = vld [vmem:[%s4470_s5 + $0x68] sm:$0xff] }
  0x18   : > { %3105 = vmatprep.subr.bf16.mxu1 %v3104_v26  ;;  %v3144_v3 = vpack.c.bf16 %v987_v2, %v986_v1  ;;  %v2383_v4 = vld [vmem:[%s4467_s2] ss:$0 sm:$0xff]  ;;  %v988_v53 = vld [vmem:[%s4470_s5 + $0x70] sm:$0xff]  ;;  %v989_v54 = vld [vmem:[%s4470_s5 + $0x78] sm:$0xff] }
  0x19   : > { %2663 = vmatpush3.msra.mxu0 %v572_v14  ;;  %v1174_v56 = vld [vmem:[%s4472_s7] sm:$0xff]  ;;  %v1175_v57 = vld [vmem:[%s4472_s7 + $0x8] sm:$0xff]  ;;  %v1177_v60 = vld [vmem:[%s4472_s7 + $0x18] sm:$0xff] }
  0x1a   : > { %2665 = vmatmul.mubr.msk.f32.vlgmr.msra.gmra.mrb[0].mxu0 %vm580_vm0, %v553_v19  ;;  %3121 = vmatprep.subr.bf16.mxu0 %v3120_v50  ;;  %v3152_v59 = vpack.c.bf16 %v1175_v57, %v1174_v56  ;;  %v1178_v62 = vld [vmem:[%s4472_s7 + $0x20] sm:$0xff]  ;;  %v1179_v63 = vld [vmem:[%s4472_s7 + $0x28] sm:$0xff]  ;;  %v1180_v1 = vld [vmem:[%s4472_s7 + $0x30] sm:$0xff] }
  0x1b   : > { %2667 = vmatprep.mubr.msk.f32.mxu0 %vm580_vm0, %v554_v20  ;;  %3107 = vmatpush3.bf16.msra.mxu1 %v3104_v26  ;;  %v1181_v2 = vld [vmem:[%s4472_s7 + $0x38] sm:$0xff] }
  0x1c   : > { %3109 = vmatprep.subr.bf16.mxu1 %v3108_v31  ;;  %3123 = vmatpush3.bf16.msra.mxu0 %v3120_v50 }
  0x1d   : > { %3125 = vmatprep.subr.bf16.mxu0 %v3124_v52 }
  0x1e   : > { %2668 = vmatmul.mubr.msk.f32.gmra.mrb[2].mxu0 %vm580_vm0, %v555_v24 }
  0x1f   : > { %2670 = vmatprep.mubr.msk.f32.mxu0 %vm580_vm0, %v556_v25  ;;  %3111 = vmatpush3.bf16.msra.mxu1 %v3108_v31 }
  0x20   : > { %3113 = vmatprep.subr.bf16.mxu1 %v3112_v36  ;;  %3127 = vmatpush3.bf16.msra.mxu0 %v3124_v52 }
  0x21   : > { %3129 = vmatprep.subr.bf16.mxu0 %v3128_v55 }
  0x22   : > { %2671 = vmatmul.mubr.msk.f32.gmra.mrb[4].mxu0 %vm580_vm0, %v557_v29 }
  0x23   : > { %2673 = vmatprep.mubr.msk.f32.mxu0 %vm580_vm0, %v558_v30  ;;  %3115 = vmatpush3.bf16.msra.mxu1 %v3112_v36 }
  0x24   : > { %3117 = vmatprep.subr.bf16.mxu1 %v3116_v46  ;;  %3131 = vmatpush3.bf16.msra.mxu0 %v3128_v55  ;;  %v3148_v55 = vpack.c.bf16 %v989_v54, %v988_v53 }
  0x25   : > { %3133 = vmatprep.subr.bf16.mxu0 %v3132_v58 }
  0x26   : > { %2674 = vmatmul.mubr.msk.f32.gmra.mrb[6].mxu0 %vm580_vm0, %v559_v34 }
  0x27   : > { %2676 = vmatprep.mubr.msk.f32.mxu0 %vm580_vm0, %v560_v35  ;;  %3119 = vmatpush3.bf16.msra.mxu1 %v3116_v46 }
  0x28   : > { %3135 = vmatpush3.bf16.msra.mxu0 %v3132_v58  ;;  %v1176_v58 = vld [vmem:[%s4472_s7 + $0x10] sm:$0xff]  ;;  %3153 = vmatprep.subr.bf16.mxu1 %v3152_v59 }
  0x29   : > { %3137 = vmatprep.subr.bf16.mxu0 %v3136_v61 }
  0x2a   : > { %2677 = vmatmul.mubr.msk.f32.gmra.mrb[8].mxu0 %vm580_vm0, %v561_v37 }
  0x2b   : > { %2679 = vmatprep.mubr.msk.f32.mxu0 %vm580_vm0, %v562_v38 }
  0x2c   : > { %3139 = vmatpush3.bf16.msra.mxu0 %v3136_v61  ;;  %v3156_v61 = vpack.c.bf16 %v1177_v60, %v1176_v58 }
  0x2d   : > { %3141 = vmatprep.subr.bf16.mxu0 %v3140_v0 }
  0x2e   : > { %2680 = vmatmul.mubr.msk.f32.gmra.mrb[10].mxu0 %vm580_vm0, %v563_v39 }
  0x2f   : > { %2682 = vmatprep.mubr.msk.f32.mxu0 %vm580_vm0, %v564_v40 }
  0x30   : > { %3143 = vmatpush3.bf16.msra.mxu0 %v3140_v0  ;;  %v3160_v0 = vpack.c.bf16 %v1179_v63, %v1178_v62 }
  0x31   : > { %3145 = vmatprep.subr.bf16.mxu0 %v3144_v3 }
  0x32   : > { %2683 = vmatmul.mubr.msk.f32.gmra.mrb[12].mxu0 %vm580_vm0, %v565_v41 }
  0x33   : > { %2685 = vmatprep.mubr.msk.f32.mxu0 %vm580_vm0, %v566_v42 }
  0x34   : > { %3147 = vmatpush3.bf16.msra.mxu0 %v3144_v3  ;;  %v3164_v3 = vpack.c.bf16 %v1181_v2, %v1180_v1 }
  0x35   : > { %3149 = vmatprep.subr.bf16.mxu0 %v3148_v55 }
  0x36   : > { %2686 = vmatmul.mubr.msk.f32.gmra.mrb[14].mxu0 %vm580_vm0, %v567_v43 }
  0x38   : > { %3151 = vmatpush3.bf16.msra.mxu0 %v3148_v55 }
  0xed   : > { %v2666_v5 = vpop.f32.mrb[0].mxu0 }
  0xee   : > { %v3656_v6 = vadd.f32 %v2666_v5, %v2383_v4  ;;  %v695_v7 = vpop.f32.mrb[1].mxu0  ;;  %v1183_v5 = vld [vmem:[%s4472_s7 + $0x48] sm:$0xff] }
  0xef   : > { %v3658_v8 = vadd.f32 %v2383_v4, %v695_v7 }
  0xf0   : > { %v775_v11 = vmax.f32 %v3656_v6, 0.0 }
  0xf1   : > { %v774_v9 = vmax.f32 %v3658_v8, 0.0  ;;  %v2669_v10 = vpop.f32.mrb[2].mxu0 }
  0xf2   : > { %v3662_v12 = vadd.f32 %v2669_v10, %v2383_v4  ;;  %v705_v13 = vpop.f32.mrb[3].mxu0  ;;  %v1184_v10 = vld [vmem:[%s4472_s7 + $0x50] sm:$0xff] }
  0xf3   : > { %v3664_v14 = vadd.f32 %v2383_v4, %v705_v13  ;;  %2720 = vmatprep.mubr.f32.mxu1 %v774_v9  ;;  %v1185_v13 = vld [vmem:[%s4472_s7 + $0x58] sm:$0xff] }
  0xf4   : > { %2721 = vmatmul.mubr.f32.vlgmr.msra.gmra.mrb[0].mxu1 %v775_v11  ;;  %v777_v17 = vmax.f32 %v3662_v12, 0.0 }
  0xf5   : > { %v776_v15 = vmax.f32 %v3664_v14, 0.0  ;;  %v2672_v16 = vpop.f32.mrb[4].mxu0  ;;  %3155 = vmatpush3.bf16.msra.mxu1 %v3152_v59 }
  0xf6   : > { %v3672_v18 = vadd.f32 %v2672_v16, %v2383_v4  ;;  %v715_v19 = vpop.f32.mrb[5].mxu0  ;;  %3157 = vmatprep.subr.bf16.mxu1 %v3156_v61  ;;  %v3172_v16 = vpack.c.bf16 %v1185_v13, %v1184_v10 }
  0xf7   : > { %v3674_v20 = vadd.f32 %v2383_v4, %v715_v19  ;;  %2723 = vmatprep.mubr.f32.mxu1 %v776_v15  ;;  %v2400_v19 = vld [vmem:[%s4469_s4] ss:$0 sm:$0xff] }
  0xf8   : > { %v779_v21 = vmax.f32 %v3672_v18, 0.0  ;;  %2724 = vmatmul.mubr.f32.gmra.mrb[2].mxu1 %v777_v17 }
  0xf9   : > { %v778_v22 = vmax.f32 %v3674_v20, 0.0  ;;  %v2675_v23 = vpop.f32.mrb[6].mxu0  ;;  %3159 = vmatpush3.bf16.msra.mxu1 %v3156_v61 }
  0xfa   : > { %v3682_v24 = vadd.f32 %v2675_v23, %v2383_v4  ;;  %v725_v25 = vpop.f32.mrb[7].mxu0  ;;  %3161 = vmatprep.subr.bf16.mxu1 %v3160_v0 }
  0xfb   : > { %v3684_v26 = vadd.f32 %v2383_v4, %v725_v25  ;;  %2726 = vmatprep.mubr.f32.mxu1 %v778_v22 }
  0xfc   : > { %v781_v27 = vmax.f32 %v3682_v24, 0.0  ;;  %2727 = vmatmul.mubr.f32.gmra.mrb[4].mxu1 %v779_v21 }
  0xfd   : > { %v780_v28 = vmax.f32 %v3684_v26, 0.0  ;;  %v2678_v29 = vpop.f32.mrb[8].mxu0  ;;  %3163 = vmatpush3.bf16.msra.mxu1 %v3160_v0 }
  0xfe   : > { %v3692_v30 = vadd.f32 %v2678_v29, %v2383_v4  ;;  %v735_v31 = vpop.f32.mrb[9].mxu0  ;;  %3165 = vmatprep.subr.bf16.mxu1 %v3164_v3 }
  0xff   : > { %v3694_v32 = vadd.f32 %v2383_v4, %v735_v31  ;;  %2729 = vmatprep.mubr.f32.mxu1 %v780_v28 }
 0x100   : > { %v783_v33 = vmax.f32 %v3692_v30, 0.0  ;;  %2730 = vmatmul.mubr.f32.gmra.mrb[6].mxu1 %v781_v27 }
 0x101   : > { %v782_v34 = vmax.f32 %v3694_v32, 0.0  ;;  %v2681_v35 = vpop.f32.mrb[10].mxu0  ;;  %3167 = vmatpush3.bf16.msra.mxu1 %v3164_v3 }
 0x102   : > { %v3702_v36 = vadd.f32 %v2681_v35, %v2383_v4  ;;  %v745_v37 = vpop.f32.mrb[11].mxu0 }
 0x103   : > { %v3704_v38 = vadd.f32 %v2383_v4, %v745_v37  ;;  %2732 = vmatprep.mubr.f32.mxu1 %v782_v34 }
 0x104   : > { %v785_v39 = vmax.f32 %v3702_v36, 0.0  ;;  %2733 = vmatmul.mubr.f32.gmra.mrb[8].mxu1 %v783_v33 }
 0x105   : > { %v784_v40 = vmax.f32 %v3704_v38, 0.0  ;;  %v2684_v41 = vpop.f32.mrb[12].mxu0 }
 0x106   : > { %v3712_v42 = vadd.f32 %v2684_v41, %v2383_v4  ;;  %v755_v43 = vpop.f32.mrb[13].mxu0 }
 0x107   : > { %v3714_v44 = vadd.f32 %v2383_v4, %v755_v43  ;;  %2735 = vmatprep.mubr.f32.mxu1 %v784_v40 }
 0x108   : > { %v787_v45 = vmax.f32 %v3712_v42, 0.0  ;;  %2736 = vmatmul.mubr.f32.gmra.mrb[10].mxu1 %v785_v39 }
 0x109   : > { %v786_v46 = vmax.f32 %v3714_v44, 0.0  ;;  %v2687_v47 = vpop.f32.mrb[14].mxu0 }
 0x10a   : > { %v3722_v48 = vadd.f32 %v2687_v47, %v2383_v4  ;;  %v765_v49 = vpop.f32.mrb[15].mxu0 }
 0x10b   : > { %v3724_v50 = vadd.f32 %v2383_v4, %v765_v49  ;;  %2738 = vmatprep.mubr.f32.mxu1 %v786_v46  ;;  %v1182_v4 = vld [vmem:[%s4472_s7 + $0x40] sm:$0xff] }
 0x10c   : > { %v789_v51 = vmax.f32 %v3722_v48, 0.0  ;;  %2739 = vmatmul.mubr.f32.gmra.mrb[12].mxu1 %v787_v45  ;;  %v3168_v7 = vpack.c.bf16 %v1183_v5, %v1182_v4  ;;  %v1372_v48 = vld [vmem:[%s4474_s9 + $0x70] sm:$0xff] }
 0x10d   : > { %v788_v52 = vmax.f32 %v3724_v50, 0.0  ;;  %v1373_v50 = vld [vmem:[%s4474_s9 + $0x78] sm:$0xff] }
 0x10e   : > { %3169 = vmatprep.subr.bf16.mxu1 %v3168_v7 }
 0x10f   : > { %2741 = vmatprep.mubr.f32.mxu1 %v788_v52  ;;  %3171 = vmatpush3.bf16.msra.mxu1 %v3168_v7 }
 0x110   : > { %2742 = vmatmul.mubr.f32.gmra.mrb[14].mxu1 %v789_v51  ;;  %3173 = vmatprep.subr.bf16.mxu1 %v3172_v16 }
 0x113   : > { %3175 = vmatpush3.bf16.msra.mxu1 %v3172_v16 }
 0x1c7   : > { %v2722_v23 = vpop.f32.mrb[0].mxu1 }
 0x1c8   : > { %v885_v25 = vadd.f32 %v2722_v23, %v2400_v19  ;;  %v879_v29 = vpop.f32.mrb[1].mxu1 }
 0x1c9   : > { %v880_v31 = vadd.f32 %v2400_v19, %v879_v29 }
 0x1ca   : > { %v959_v41 = vmax.f32 %v885_v25, 0.0 }
 0x1cb   : > { %v958_v35 = vmax.f32 %v880_v31, 0.0  ;;  %v2725_v37 = vpop.f32.mrb[2].mxu1 }
 0x1cc   : > { %v895_v43 = vadd.f32 %v2725_v37, %v2400_v19  ;;  %v889_v47 = vpop.f32.mrb[3].mxu1 }
 0x1cd   : > { %v890_v49 = vadd.f32 %v2400_v19, %v889_v47  ;;  %2776 = vmatprep.mubr.f32.mxu0 %v958_v35 }
 0x1ce   : > { %2777 = vmatmul.mubr.f32.vlgmr.msra.gmra.mrb[16].mxu0 %v959_v41  ;;  %v961_v55 = vmax.f32 %v895_v43, 0.0 }
 0x1cf   : > { %v960_v53 = vmax.f32 %v890_v49, 0.0  ;;  %v2728_v54 = vpop.f32.mrb[4].mxu1 }
 0x1d0   : > { %v905_v56 = vadd.f32 %v2728_v54, %v2400_v19  ;;  %v899_v57 = vpop.f32.mrb[5].mxu1 }
 0x1d1   : > { %v900_v58 = vadd.f32 %v2400_v19, %v899_v57  ;;  %2779 = vmatprep.mubr.f32.mxu0 %v960_v53 }
 0x1d2   : > { %v963_v59 = vmax.f32 %v905_v56, 0.0  ;;  %2780 = vmatmul.mubr.f32.gmra.mrb[18].mxu0 %v961_v55 }
 0x1d3   : > { %v962_v60 = vmax.f32 %v900_v58, 0.0  ;;  %v2731_v61 = vpop.f32.mrb[6].mxu1 }
 0x1d4   : > { %v915_v62 = vadd.f32 %v2731_v61, %v2400_v19  ;;  %v909_v63 = vpop.f32.mrb[7].mxu1  ;;  %v1187_v61 = vld [vmem:[%s4472_s7 + $0x68] sm:$0xff] }
 0x1d5   : > { %v910_v0 = vadd.f32 %v2400_v19, %v909_v63  ;;  %2782 = vmatprep.mubr.f32.mxu0 %v962_v60  ;;  %v1186_v60 = vld [vmem:[%s4472_s7 + $0x60] sm:$0xff]  ;;  %v1189_v63 = vld [vmem:[%s4472_s7 + $0x78] sm:$0xff] }
 0x1d6   : > { %v965_v1 = vmax.f32 %v915_v62, 0.0  ;;  %2783 = vmatmul.mubr.f32.gmra.mrb[20].mxu0 %v963_v59  ;;  %v3176_v62 = vpack.c.bf16 %v1187_v61, %v1186_v60 }
 0x1d7   : > { %v964_v2 = vmax.f32 %v910_v0, 0.0  ;;  %v2734_v3 = vpop.f32.mrb[8].mxu1 }
 0x1d8   : > { %v925_v4 = vadd.f32 %v2734_v3, %v2400_v19  ;;  %v919_v5 = vpop.f32.mrb[9].mxu1  ;;  %3177 = vmatprep.subr.bf16.mxu1 %v3176_v62  ;;  %v1360_v3 = vld [vmem:[%s4474_s9 + $0x10] sm:$0xff] }
 0x1d9   : > { %v920_v7 = vadd.f32 %v2400_v19, %v919_v5  ;;  %2785 = vmatprep.mubr.f32.mxu0 %v964_v2  ;;  %3179 = vmatpush3.bf16.msra.mxu1 %v3176_v62  ;;  %v1359_v2 = vld [vmem:[%s4474_s9 + $0x8] sm:$0xff]  ;;  %v1361_v5 = vld [vmem:[%s4474_s9 + $0x18] sm:$0xff] }
 0x1da   : > { %v967_v10 = vmax.f32 %v925_v4, 0.0  ;;  %2786 = vmatmul.mubr.f32.gmra.mrb[22].mxu0 %v965_v1  ;;  %v1358_v1 = vld [vmem:[%s4474_s9] sm:$0xff] }
 0x1db   : > { %v966_v13 = vmax.f32 %v920_v7, 0.0  ;;  %v2737_v16 = vpop.f32.mrb[10].mxu1  ;;  %v3184_v4 = vpack.c.bf16 %v1359_v2, %v1358_v1  ;;  %v3188_v7 = vpack.c.bf16 %v1361_v5, %v1360_v3 }
 0x1dc   : > { %v935_v23 = vadd.f32 %v2737_v16, %v2400_v19  ;;  %v929_v25 = vpop.f32.mrb[11].mxu1 }
 0x1dd   : > { %v930_v29 = vadd.f32 %v2400_v19, %v929_v25  ;;  %2788 = vmatprep.mubr.f32.mxu0 %v966_v13  ;;  %v1363_v13 = vld [vmem:[%s4474_s9 + $0x28] sm:$0xff]  ;;  %3185 = vmatprep.subr.bf16.mxu0 %v3184_v4  ;;  %v1365_v25 = vld [vmem:[%s4474_s9 + $0x38] sm:$0xff] }
 0x1de   : > { %v969_v31 = vmax.f32 %v935_v23, 0.0  ;;  %2789 = vmatmul.mubr.f32.gmra.mrb[24].mxu0 %v967_v10  ;;  %v1362_v10 = vld [vmem:[%s4474_s9 + $0x20] sm:$0xff]  ;;  %v1364_v23 = vld [vmem:[%s4474_s9 + $0x30] sm:$0xff] }
 0x1df   : > { %v968_v35 = vmax.f32 %v930_v29, 0.0  ;;  %v2740_v37 = vpop.f32.mrb[12].mxu1  ;;  %3187 = vmatpush3.bf16.msra.mxu0 %v3184_v4  ;;  %v3192_v16 = vpack.c.bf16 %v1363_v13, %v1362_v10  ;;  %v3196_v29 = vpack.c.bf16 %v1365_v25, %v1364_v23 }
 0x1e0   : > { %v945_v41 = vadd.f32 %v2740_v37, %v2400_v19  ;;  %v939_v43 = vpop.f32.mrb[13].mxu1  ;;  %3189 = vmatprep.subr.bf16.mxu0 %v3188_v7 }
 0x1e1   : > { %v940_v47 = vadd.f32 %v2400_v19, %v939_v43  ;;  %2791 = vmatprep.mubr.f32.mxu0 %v968_v35  ;;  %v1367_v35 = vld [vmem:[%s4474_s9 + $0x48] sm:$0xff]  ;;  %v1369_v43 = vld [vmem:[%s4474_s9 + $0x58] sm:$0xff] }
 0x1e2   : > { %v971_v49 = vmax.f32 %v945_v41, 0.0  ;;  %2792 = vmatmul.mubr.f32.gmra.mrb[26].mxu0 %v969_v31  ;;  %v1366_v31 = vld [vmem:[%s4474_s9 + $0x40] sm:$0xff]  ;;  %v1368_v41 = vld [vmem:[%s4474_s9 + $0x50] sm:$0xff] }
 0x1e3   : > { %v970_v53 = vmax.f32 %v940_v47, 0.0  ;;  %v2743_v54 = vpop.f32.mrb[14].mxu1  ;;  %3191 = vmatpush3.bf16.msra.mxu0 %v3188_v7  ;;  %v3200_v37 = vpack.c.bf16 %v1367_v35, %v1366_v31  ;;  %v3204_v47 = vpack.c.bf16 %v1369_v43, %v1368_v41 }
 0x1e4   : > { %v955_v55 = vadd.f32 %v2743_v54, %v2400_v19  ;;  %v949_v56 = vpop.f32.mrb[15].mxu1  ;;  %3193 = vmatprep.subr.bf16.mxu0 %v3192_v16 }
 0x1e5   : > { %v950_v57 = vadd.f32 %v2400_v19, %v949_v56  ;;  %2794 = vmatprep.mubr.f32.mxu0 %v970_v53  ;;  %v1188_v19 = vld [vmem:[%s4472_s7 + $0x70] sm:$0xff]  ;;  %v1371_v53 = vld [vmem:[%s4474_s9 + $0x68] sm:$0xff] }
 0x1e6   : > { %v973_v58 = vmax.f32 %v955_v55, 0.0  ;;  %2795 = vmatmul.mubr.f32.gmra.mrb[28].mxu0 %v971_v49  ;;  %v3180_v0 = vpack.c.bf16 %v1189_v63, %v1188_v19  ;;  %v1370_v49 = vld [vmem:[%s4474_s9 + $0x60] sm:$0xff] }
 0x1e7   : > { %v972_v59 = vmax.f32 %v950_v57, 0.0  ;;  %3195 = vmatpush3.bf16.msra.mxu0 %v3192_v16  ;;  %v3208_v54 = vpack.c.bf16 %v1371_v53, %v1370_v49  ;;  %v3838_v55 = vld [vmem:[%s4471_s6] ss:$0 sm:$0xff] }
 0x1e8   : > { %3181 = vmatprep.subr.bf16.mxu1 %v3180_v0  ;;  %3197 = vmatprep.subr.bf16.mxu0 %v3196_v29 }
 0x1e9   : > { %2797 = vmatprep.mubr.f32.mxu0 %v972_v59  ;;  %3183 = vmatpush3.bf16.msra.mxu1 %v3180_v0 }
 0x1ea   : > { %2798 = vmatmul.mubr.f32.gmra.mrb[30].mxu0 %v973_v58 }
 0x1eb   : > { %3199 = vmatpush3.bf16.msra.mxu0 %v3196_v29 }
 0x1ec   : > { %3201 = vmatprep.subr.bf16.mxu0 %v3200_v37 }
 0x1ef   : > { %3203 = vmatpush3.bf16.msra.mxu0 %v3200_v37 }
 0x1f0   : > { %3205 = vmatprep.subr.bf16.mxu0 %v3204_v47 }
 0x1f3   : > { %3207 = vmatpush3.bf16.msra.mxu0 %v3204_v47 }
 0x1f4   : > { %3209 = vmatprep.subr.bf16.mxu0 %v3208_v54 }
 0x1f7   : > { %3211 = vmatpush3.bf16.msra.mxu0 %v3208_v54 }
 0x2a1   : > { %v2778_v56 = vpop.f32.mrb[16].mxu0 }
 0x2a2   : > { %v1069_v57 = vadd.f32 %v2778_v56, %v3838_v55  ;;  %v1063_v58 = vpop.f32.mrb[17].mxu0 }
 0x2a3   : > { %v1064_v59 = vadd.f32 %v3838_v55, %v1063_v58 }
 0x2a4   : > { %v3844_v60 = vadd.f32 %v1069_v57, %v775_v11 }
 0x2a5   : > { %v3848_v61 = vadd.f32 %v1064_v59, %v774_v9  ;;  %v2781_v62 = vpop.f32.mrb[18].mxu0 }
 0x2a6   : > { %v1079_v19 = vadd.f32 %v2781_v62, %v3838_v55  ;;  %v1073_v63 = vpop.f32.mrb[19].mxu0  ;;  %v1159_v2 = vmax.f32 %v3844_v60, 0.0  ;;  %v1559_v62 = vld [vmem:[%s4476_s11 + $0x8] sm:$0xff] }
 0x2a7   : > { %v1158_v0 = vmax.f32 %v3848_v61, 0.0  ;;  %v1074_v1 = vadd.f32 %v3838_v55, %v1073_v63 }
 0x2a8   : > { %v3856_v3 = vadd.f32 %v1079_v19, %v777_v17  ;;  %v1560_v19 = vld [vmem:[%s4476_s11 + $0x10] sm:$0xff] }
 0x2a9   : > { %v3860_v6 = vadd.f32 %v1074_v1, %v776_v15  ;;  %v2784_v8 = vpop.f32.mrb[20].mxu0  ;;  %2832 = vmatprep.mubr.f32.mxu1 %v1158_v0  ;;  %v1561_v1 = vld [vmem:[%s4476_s11 + $0x18] sm:$0xff] }
 0x2aa   : > { %v1089_v9 = vadd.f32 %v2784_v8, %v3838_v55  ;;  %v1083_v11 = vpop.f32.mrb[21].mxu0  ;;  %2833 = vmatmul.mubr.f32.vlgmr.msra.gmra.mrb[16].mxu1 %v1159_v2  ;;  %v1161_v17 = vmax.f32 %v3856_v3, 0.0  ;;  %v3220_v8 = vpack.c.bf16 %v1561_v1, %v1560_v19 }
 0x2ab   : > { %v1160_v4 = vmax.f32 %v3860_v6, 0.0  ;;  %v1084_v12 = vadd.f32 %v3838_v55, %v1083_v11  ;;  %v1563_v11 = vld [vmem:[%s4476_s11 + $0x28] sm:$0xff] }
 0x2ac   : > { %v3872_v14 = vadd.f32 %v1089_v9, %v779_v21  ;;  %v1562_v9 = vld [vmem:[%s4476_s11 + $0x20] sm:$0xff] }
 0x2ad   : > { %v3876_v15 = vadd.f32 %v1084_v12, %v778_v22  ;;  %v2787_v5 = vpop.f32.mrb[22].mxu0  ;;  %2835 = vmatprep.mubr.f32.mxu1 %v1160_v4  ;;  %v3224_v12 = vpack.c.bf16 %v1563_v11, %v1562_v9 }
 0x2ae   : > { %v1099_v7 = vadd.f32 %v2787_v5, %v3838_v55  ;;  %v1093_v10 = vpop.f32.mrb[23].mxu0  ;;  %2836 = vmatmul.mubr.f32.gmra.mrb[18].mxu1 %v1161_v17  ;;  %v1163_v21 = vmax.f32 %v3872_v14, 0.0  ;;  %v1564_v5 = vld [vmem:[%s4476_s11 + $0x30] sm:$0xff] }
 0x2af   : > { %v1162_v13 = vmax.f32 %v3876_v15, 0.0  ;;  %v1094_v18 = vadd.f32 %v3838_v55, %v1093_v10 }
 0x2b0   : > { %v3888_v20 = vadd.f32 %v1099_v7, %v781_v27  ;;  %v1565_v7 = vld [vmem:[%s4476_s11 + $0x38] sm:$0xff] }
 0x2b1   : > { %v3892_v22 = vadd.f32 %v1094_v18, %v780_v28  ;;  %v2790_v16 = vpop.f32.mrb[24].mxu0  ;;  %2838 = vmatprep.mubr.f32.mxu1 %v1162_v13  ;;  %v3228_v10 = vpack.c.bf16 %v1565_v7, %v1564_v5  ;;  %v1566_v18 = vld [vmem:[%s4476_s11 + $0x40] sm:$0xff] }
 0x2b2   : > { %v1109_v23 = vadd.f32 %v2790_v16, %v3838_v55  ;;  %v1103_v25 = vpop.f32.mrb[25].mxu0  ;;  %2839 = vmatmul.mubr.f32.gmra.mrb[20].mxu1 %v1163_v21  ;;  %v1165_v27 = vmax.f32 %v3888_v20, 0.0  ;;  %v1567_v16 = vld [vmem:[%s4476_s11 + $0x48] sm:$0xff] }
 0x2b3   : > { %v1164_v29 = vmax.f32 %v3892_v22, 0.0  ;;  %v1104_v24 = vadd.f32 %v3838_v55, %v1103_v25  ;;  %v1568_v25 = vld [vmem:[%s4476_s11 + $0x50] sm:$0xff] }
 0x2b4   : > { %v3904_v26 = vadd.f32 %v1109_v23, %v783_v33  ;;  %v3232_v23 = vpack.c.bf16 %v1567_v16, %v1566_v18 }
 0x2b5   : > { %v3908_v28 = vadd.f32 %v1104_v24, %v782_v34  ;;  %v2793_v31 = vpop.f32.mrb[26].mxu0  ;;  %2841 = vmatprep.mubr.f32.mxu1 %v1164_v29  ;;  %v1569_v24 = vld [vmem:[%s4476_s11 + $0x58] sm:$0xff] }
 0x2b6   : > { %v1119_v35 = vadd.f32 %v2793_v31, %v3838_v55  ;;  %v1113_v37 = vpop.f32.mrb[27].mxu0  ;;  %2842 = vmatmul.mubr.f32.gmra.mrb[22].mxu1 %v1165_v27  ;;  %v1167_v33 = vmax.f32 %v3904_v26, 0.0  ;;  %v3236_v31 = vpack.c.bf16 %v1569_v24, %v1568_v25 }
 0x2b7   : > { %v1166_v41 = vmax.f32 %v3908_v28, 0.0  ;;  %v1114_v30 = vadd.f32 %v3838_v55, %v1113_v37 }
 0x2b8   : > { %v3920_v32 = vadd.f32 %v1119_v35, %v785_v39  ;;  %v2402_v35 = vld [vmem:[%s4473_s8] ss:$0 sm:$0xff] }
 0x2b9   : > { %v3924_v34 = vadd.f32 %v1114_v30, %v784_v40  ;;  %v2796_v43 = vpop.f32.mrb[28].mxu0  ;;  %2844 = vmatprep.mubr.f32.mxu1 %v1166_v41 }
 0x2ba   : > { %v1129_v47 = vadd.f32 %v2796_v43, %v3838_v55  ;;  %v1123_v49 = vpop.f32.mrb[29].mxu0  ;;  %2845 = vmatmul.mubr.f32.gmra.mrb[24].mxu1 %v1167_v33  ;;  %v1169_v39 = vmax.f32 %v3920_v32, 0.0 }
 0x2bb   : > { %v1168_v53 = vmax.f32 %v3924_v34, 0.0  ;;  %v1124_v36 = vadd.f32 %v3838_v55, %v1123_v49 }
 0x2bc   : > { %v3936_v38 = vadd.f32 %v1129_v47, %v787_v45 }
 0x2bd   : > { %v3940_v40 = vadd.f32 %v1124_v36, %v786_v46  ;;  %v2799_v54 = vpop.f32.mrb[30].mxu0  ;;  %2847 = vmatprep.mubr.f32.mxu1 %v1168_v53 }
 0x2be   : > { %v1139_v56 = vadd.f32 %v2799_v54, %v3838_v55  ;;  %v1133_v57 = vpop.f32.mrb[31].mxu0  ;;  %2848 = vmatmul.mubr.f32.gmra.mrb[26].mxu1 %v1169_v39  ;;  %v1171_v45 = vmax.f32 %v3936_v38, 0.0 }
 0x2bf   : > { %v1170_v58 = vmax.f32 %v3940_v40, 0.0  ;;  %v1134_v42 = vadd.f32 %v3838_v55, %v1133_v57 }
 0x2c0   : > { %v3952_v44 = vadd.f32 %v1139_v56, %v789_v51  ;;  %v3212_v51 = vpack.c.bf16 %v1373_v50, %v1372_v48 }
 0x2c1   : > { %v3956_v46 = vadd.f32 %v1134_v42, %v788_v52  ;;  %2850 = vmatprep.mubr.f32.mxu1 %v1170_v58  ;;  %v1558_v52 = vld [vmem:[%s4476_s11] sm:$0xff] }
 0x2c2   : > { %2851 = vmatmul.mubr.f32.gmra.mrb[28].mxu1 %v1171_v45  ;;  %v1173_v55 = vmax.f32 %v3952_v44, 0.0  ;;  %3213 = vmatprep.subr.bf16.mxu0 %v3212_v51  ;;  %v3216_v63 = vpack.c.bf16 %v1559_v62, %v1558_v52  ;;  %v1756_v44 = vld [vmem:[%s4478_s13 + $0x70] sm:$0xff] }
 0x2c3   : > { %v1172_v59 = vmax.f32 %v3956_v46, 0.0  ;;  %3215 = vmatpush3.bf16.msra.mxu0 %v3212_v51  ;;  %v1757_v46 = vld [vmem:[%s4478_s13 + $0x78] sm:$0xff] }
 0x2c4   : > { %3217 = vmatprep.subr.bf16.mxu1 %v3216_v63 }
 0x2c5   : > { %2853 = vmatprep.mubr.f32.mxu1 %v1172_v59  ;;  %3219 = vmatpush3.bf16.msra.mxu1 %v3216_v63 }
 0x2c6   : > { %2854 = vmatmul.mubr.f32.gmra.mrb[30].mxu1 %v1173_v55  ;;  %3221 = vmatprep.subr.bf16.mxu1 %v3220_v8 }
 0x2c9   : > { %3223 = vmatpush3.bf16.msra.mxu1 %v3220_v8 }
 0x2ca   : > { %3225 = vmatprep.subr.bf16.mxu1 %v3224_v12 }
 0x2cd   : > { %3227 = vmatpush3.bf16.msra.mxu1 %v3224_v12 }
 0x2ce   : > { %3229 = vmatprep.subr.bf16.mxu1 %v3228_v10 }
 0x2d1   : > { %3231 = vmatpush3.bf16.msra.mxu1 %v3228_v10 }
 0x2d2   : > { %3233 = vmatprep.subr.bf16.mxu1 %v3232_v23 }
 0x2d5   : > { %3235 = vmatpush3.bf16.msra.mxu1 %v3232_v23 }
 0x2d6   : > { %3237 = vmatprep.subr.bf16.mxu1 %v3236_v31 }
 0x2d9   : > { %3239 = vmatpush3.bf16.msra.mxu1 %v3236_v31 }
 0x37d   : > { %v2834_v37 = vpop.f32.mrb[16].mxu1 }
 0x37e   : > { %v1269_v30 = vadd.f32 %v2834_v37, %v2402_v35  ;;  %v1263_v43 = vpop.f32.mrb[17].mxu1 }
 0x37f   : > { %v1264_v47 = vadd.f32 %v2402_v35, %v1263_v43 }
 0x380   : > { %v1343_v54 = vmax.f32 %v1269_v30, 0.0 }
 0x381   : > { %v1342_v49 = vmax.f32 %v1264_v47, 0.0  ;;  %v2837_v36 = vpop.f32.mrb[18].mxu1 }
 0x382   : > { %v1279_v56 = vadd.f32 %v2837_v36, %v2402_v35  ;;  %v1273_v57 = vpop.f32.mrb[19].mxu1 }
 0x383   : > { %v1274_v42 = vadd.f32 %v2402_v35, %v1273_v57  ;;  %2888 = vmatprep.mubr.f32.mxu0 %v1342_v49 }
 0x384   : > { %2889 = vmatmul.mubr.f32.vlgmr.msra.gmra.mrb[32].mxu0 %v1343_v54  ;;  %v1345_v51 = vmax.f32 %v1279_v56, 0.0 }
 0x385   : > { %v1344_v48 = vmax.f32 %v1274_v42, 0.0  ;;  %v2840_v50 = vpop.f32.mrb[20].mxu1 }
 0x386   : > { %v1289_v52 = vadd.f32 %v2840_v50, %v2402_v35  ;;  %v1283_v62 = vpop.f32.mrb[21].mxu1 }
 0x387   : > { %v1284_v19 = vadd.f32 %v2402_v35, %v1283_v62  ;;  %2891 = vmatprep.mubr.f32.mxu0 %v1344_v48 }
 0x388   : > { %2892 = vmatmul.mubr.f32.gmra.mrb[34].mxu0 %v1345_v51  ;;  %v1347_v8 = vmax.f32 %v1289_v52, 0.0 }
 0x389   : > { %v1346_v63 = vmax.f32 %v1284_v19, 0.0  ;;  %v2843_v1 = vpop.f32.mrb[22].mxu1 }
 0x38a   : > { %v1299_v9 = vadd.f32 %v2843_v1, %v2402_v35  ;;  %v1293_v11 = vpop.f32.mrb[23].mxu1  ;;  %v1570_v1 = vld [vmem:[%s4476_s11 + $0x60] sm:$0xff] }
 0x38b   : > { %v1294_v12 = vadd.f32 %v2402_v35, %v1293_v11  ;;  %2894 = vmatprep.mubr.f32.mxu0 %v1346_v63  ;;  %v1573_v11 = vld [vmem:[%s4476_s11 + $0x78] sm:$0xff] }
 0x38c   : > { %2895 = vmatmul.mubr.f32.gmra.mrb[36].mxu0 %v1347_v8  ;;  %v1349_v10 = vmax.f32 %v1299_v9, 0.0  ;;  %v1571_v8 = vld [vmem:[%s4476_s11 + $0x68] sm:$0xff] }
 0x38d   : > { %v1348_v5 = vmax.f32 %v1294_v12, 0.0  ;;  %v2846_v7 = vpop.f32.mrb[24].mxu1  ;;  %v3240_v9 = vpack.c.bf16 %v1571_v8, %v1570_v1 }
 0x38e   : > { %v1309_v18 = vadd.f32 %v2846_v7, %v2402_v35  ;;  %v1303_v16 = vpop.f32.mrb[25].mxu1  ;;  %v1743_v7 = vld [vmem:[%s4478_s13 + $0x8] sm:$0xff] }
 0x38f   : > { %v1304_v23 = vadd.f32 %v2402_v35, %v1303_v16  ;;  %2897 = vmatprep.mubr.f32.mxu0 %v1348_v5  ;;  %3241 = vmatprep.subr.bf16.mxu1 %v3240_v9  ;;  %v1742_v5 = vld [vmem:[%s4478_s13] sm:$0xff]  ;;  %v1745_v16 = vld [vmem:[%s4478_s13 + $0x18] sm:$0xff] }
 0x390   : > { %2898 = vmatmul.mubr.f32.gmra.mrb[38].mxu0 %v1349_v10  ;;  %v1351_v31 = vmax.f32 %v1309_v18, 0.0  ;;  %3243 = vmatpush3.bf16.msra.mxu1 %v3240_v9  ;;  %v1744_v10 = vld [vmem:[%s4478_s13 + $0x10] sm:$0xff]  ;;  %v3248_v18 = vpack.c.bf16 %v1743_v7, %v1742_v5 }
 0x391   : > { %v1350_v25 = vmax.f32 %v1304_v23, 0.0  ;;  %v2849_v24 = vpop.f32.mrb[26].mxu1  ;;  %v3252_v23 = vpack.c.bf16 %v1745_v16, %v1744_v10 }
 0x392   : > { %v1319_v37 = vadd.f32 %v2849_v24, %v2402_v35  ;;  %v1313_v30 = vpop.f32.mrb[27].mxu1  ;;  %v1747_v24 = vld [vmem:[%s4478_s13 + $0x28] sm:$0xff]  ;;  %3249 = vmatprep.subr.bf16.mxu0 %v3248_v18 }
 0x393   : > { %v1314_v43 = vadd.f32 %v2402_v35, %v1313_v30  ;;  %2900 = vmatprep.mubr.f32.mxu0 %v1350_v25  ;;  %v1746_v25 = vld [vmem:[%s4478_s13 + $0x20] sm:$0xff]  ;;  %3251 = vmatpush3.bf16.msra.mxu0 %v3248_v18  ;;  %v1749_v30 = vld [vmem:[%s4478_s13 + $0x38] sm:$0xff] }
 0x394   : > { %2901 = vmatmul.mubr.f32.gmra.mrb[40].mxu0 %v1351_v31  ;;  %v1353_v36 = vmax.f32 %v1319_v37, 0.0  ;;  %3253 = vmatprep.subr.bf16.mxu0 %v3252_v23  ;;  %v3256_v31 = vpack.c.bf16 %v1747_v24, %v1746_v25  ;;  %v1748_v37 = vld [vmem:[%s4478_s13 + $0x30] sm:$0xff] }
 0x395   : > { %v1352_v47 = vmax.f32 %v1314_v43, 0.0  ;;  %v2852_v49 = vpop.f32.mrb[28].mxu1  ;;  %v3260_v43 = vpack.c.bf16 %v1749_v30, %v1748_v37 }
 0x396   : > { %v1329_v54 = vadd.f32 %v2852_v49, %v2402_v35  ;;  %v1323_v56 = vpop.f32.mrb[29].mxu1  ;;  %v1751_v49 = vld [vmem:[%s4478_s13 + $0x48] sm:$0xff] }
 0x397   : > { %v1324_v57 = vadd.f32 %v2402_v35, %v1323_v56  ;;  %2903 = vmatprep.mubr.f32.mxu0 %v1352_v47  ;;  %3255 = vmatpush3.bf16.msra.mxu0 %v3252_v23  ;;  %v1750_v47 = vld [vmem:[%s4478_s13 + $0x40] sm:$0xff]  ;;  %v1753_v56 = vld [vmem:[%s4478_s13 + $0x58] sm:$0xff] }
 0x398   : > { %2904 = vmatmul.mubr.f32.gmra.mrb[42].mxu0 %v1353_v36  ;;  %v1355_v50 = vmax.f32 %v1329_v54, 0.0  ;;  %3257 = vmatprep.subr.bf16.mxu0 %v3256_v31  ;;  %v3264_v36 = vpack.c.bf16 %v1751_v49, %v1750_v47  ;;  %v1752_v54 = vld [vmem:[%s4478_s13 + $0x50] sm:$0xff] }
 0x399   : > { %v1354_v42 = vmax.f32 %v1324_v57, 0.0  ;;  %v2855_v48 = vpop.f32.mrb[30].mxu1  ;;  %v3268_v57 = vpack.c.bf16 %v1753_v56, %v1752_v54 }
 0x39a   : > { %v1339_v51 = vadd.f32 %v2855_v48, %v2402_v35  ;;  %v1333_v52 = vpop.f32.mrb[31].mxu1  ;;  %v1755_v48 = vld [vmem:[%s4478_s13 + $0x68] sm:$0xff] }
 0x39b   : > { %v1334_v62 = vadd.f32 %v2402_v35, %v1333_v52  ;;  %2906 = vmatprep.mubr.f32.mxu0 %v1354_v42  ;;  %v1572_v35 = vld [vmem:[%s4476_s11 + $0x70] sm:$0xff]  ;;  %3259 = vmatpush3.bf16.msra.mxu0 %v3256_v31  ;;  %v1754_v42 = vld [vmem:[%s4478_s13 + $0x60] sm:$0xff] }
 0x39c   : > { %2907 = vmatmul.mubr.f32.gmra.mrb[44].mxu0 %v1355_v50  ;;  %v1357_v63 = vmax.f32 %v1339_v51, 0.0  ;;  %v3244_v12 = vpack.c.bf16 %v1573_v11, %v1572_v35  ;;  %3261 = vmatprep.subr.bf16.mxu0 %v3260_v43  ;;  %v3272_v50 = vpack.c.bf16 %v1755_v48, %v1754_v42  ;;  %v4070_v51 = vld [vmem:[%s4475_s10] ss:$0 sm:$0xff] }
 0x39d   : > { %v1356_v19 = vmax.f32 %v1334_v62, 0.0 }
 0x39e   : > { %3245 = vmatprep.subr.bf16.mxu1 %v3244_v12 }
 0x39f   : > { %2909 = vmatprep.mubr.f32.mxu0 %v1356_v19  ;;  %3247 = vmatpush3.bf16.msra.mxu1 %v3244_v12 }
 0x3a0   : > { %2910 = vmatmul.mubr.f32.gmra.mrb[46].mxu0 %v1357_v63 }
 0x3a1   : > { %3263 = vmatpush3.bf16.msra.mxu0 %v3260_v43 }
 0x3a2   : > { %3265 = vmatprep.subr.bf16.mxu0 %v3264_v36 }
 0x3a5   : > { %3267 = vmatpush3.bf16.msra.mxu0 %v3264_v36 }
 0x3a6   : > { %3269 = vmatprep.subr.bf16.mxu0 %v3268_v57 }
 0x3a9   : > { %3271 = vmatpush3.bf16.msra.mxu0 %v3268_v57 }
 0x3aa   : > { %3273 = vmatprep.subr.bf16.mxu0 %v3272_v50 }
 0x3ad   : > { %3275 = vmatpush3.bf16.msra.mxu0 %v3272_v50 }
 0x457   : > { %v2890_v52 = vpop.f32.mrb[32].mxu0 }
 0x458   : > { %v1453_v62 = vadd.f32 %v2890_v52, %v4070_v51  ;;  %v1447_v19 = vpop.f32.mrb[33].mxu0 }
 0x459   : > { %v1448_v63 = vadd.f32 %v4070_v51, %v1447_v19 }
 0x45a   : > { %v4076_v1 = vadd.f32 %v1453_v62, %v1159_v2 }
 0x45b   : > { %v4080_v8 = vadd.f32 %v1448_v63, %v1158_v0  ;;  %v2893_v9 = vpop.f32.mrb[34].mxu0 }
 0x45c   : > { %v1463_v35 = vadd.f32 %v2893_v9, %v4070_v51  ;;  %v1457_v11 = vpop.f32.mrb[35].mxu0  ;;  %v1543_v7 = vmax.f32 %v4076_v1, 0.0  ;;  %v1943_v9 = vld [vmem:[%s4480_s15 + $0x8] sm:$0xff] }
 0x45d   : > { %v1542_v12 = vmax.f32 %v4080_v8, 0.0  ;;  %v1458_v5 = vadd.f32 %v4070_v51, %v1457_v11 }
 0x45e   : > { %v4088_v10 = vadd.f32 %v1463_v35, %v1161_v17  ;;  %v1944_v35 = vld [vmem:[%s4480_s15 + $0x10] sm:$0xff] }
 0x45f   : > { %v4092_v60 = vadd.f32 %v1458_v5, %v1160_v4  ;;  %v2896_v61 = vpop.f32.mrb[36].mxu0  ;;  %2944 = vmatprep.mubr.f32.mxu1 %v1542_v12  ;;  %v1945_v5 = vld [vmem:[%s4480_s15 + $0x18] sm:$0xff] }
 0x460   : > { %v1473_v0 = vadd.f32 %v2896_v61, %v4070_v51  ;;  %v1467_v2 = vpop.f32.mrb[37].mxu0  ;;  %2945 = vmatmul.mubr.f32.vlgmr.msra.gmra.mrb[32].mxu1 %v1543_v7  ;;  %v1545_v17 = vmax.f32 %v4088_v10, 0.0  ;;  %v3284_v61 = vpack.c.bf16 %v1945_v5, %v1944_v35 }
 0x461   : > { %v1544_v18 = vmax.f32 %v4092_v60, 0.0  ;;  %v1468_v3 = vadd.f32 %v4070_v51, %v1467_v2  ;;  %v1947_v2 = vld [vmem:[%s4480_s15 + $0x28] sm:$0xff] }
 0x462   : > { %v4104_v6 = vadd.f32 %v1473_v0, %v1163_v21  ;;  %v1946_v0 = vld [vmem:[%s4480_s15 + $0x20] sm:$0xff] }
 0x463   : > { %v4108_v4 = vadd.f32 %v1468_v3, %v1162_v13  ;;  %v2899_v16 = vpop.f32.mrb[38].mxu0  ;;  %2947 = vmatprep.mubr.f32.mxu1 %v1544_v18  ;;  %v3288_v3 = vpack.c.bf16 %v1947_v2, %v1946_v0 }
 0x464   : > { %v1483_v23 = vadd.f32 %v2899_v16, %v4070_v51  ;;  %v1477_v25 = vpop.f32.mrb[39].mxu0  ;;  %2948 = vmatmul.mubr.f32.gmra.mrb[34].mxu1 %v1545_v17  ;;  %v1547_v21 = vmax.f32 %v4104_v6, 0.0  ;;  %v1948_v16 = vld [vmem:[%s4480_s15 + $0x30] sm:$0xff] }
 0x465   : > { %v1546_v24 = vmax.f32 %v4108_v4, 0.0  ;;  %v1478_v14 = vadd.f32 %v4070_v51, %v1477_v25 }
 0x466   : > { %v4120_v15 = vadd.f32 %v1483_v23, %v1165_v27  ;;  %v1949_v23 = vld [vmem:[%s4480_s15 + $0x38] sm:$0xff] }
 0x467   : > { %v4124_v13 = vadd.f32 %v1478_v14, %v1164_v29  ;;  %v2902_v31 = vpop.f32.mrb[40].mxu0  ;;  %2950 = vmatprep.mubr.f32.mxu1 %v1546_v24  ;;  %v3292_v25 = vpack.c.bf16 %v1949_v23, %v1948_v16  ;;  %v1950_v14 = vld [vmem:[%s4480_s15 + $0x40] sm:$0xff] }
 0x468   : > { %v1493_v37 = vadd.f32 %v2902_v31, %v4070_v51  ;;  %v1487_v30 = vpop.f32.mrb[41].mxu0  ;;  %2951 = vmatmul.mubr.f32.gmra.mrb[36].mxu1 %v1547_v21  ;;  %v1549_v27 = vmax.f32 %v4120_v15, 0.0  ;;  %v1951_v31 = vld [vmem:[%s4480_s15 + $0x48] sm:$0xff] }
 0x469   : > { %v1548_v43 = vmax.f32 %v4124_v13, 0.0  ;;  %v1488_v20 = vadd.f32 %v4070_v51, %v1487_v30  ;;  %v1952_v30 = vld [vmem:[%s4480_s15 + $0x50] sm:$0xff] }
 0x46a   : > { %v4136_v22 = vadd.f32 %v1493_v37, %v1167_v33  ;;  %v4236_v37 = vpack.c.bf16 %v1951_v31, %v1950_v14 }
 0x46b   : > { %v4140_v29 = vadd.f32 %v1488_v20, %v1166_v41  ;;  %v2905_v47 = vpop.f32.mrb[42].mxu0  ;;  %2953 = vmatprep.mubr.f32.mxu1 %v1548_v43  ;;  %v1953_v20 = vld [vmem:[%s4480_s15 + $0x58] sm:$0xff] }
 0x46c   : > { %v1503_v49 = vadd.f32 %v2905_v47, %v4070_v51  ;;  %v1497_v36 = vpop.f32.mrb[43].mxu0  ;;  %2954 = vmatmul.mubr.f32.gmra.mrb[38].mxu1 %v1549_v27  ;;  %v1551_v33 = vmax.f32 %v4136_v22, 0.0  ;;  %v4245_v47 = vpack.c.bf16 %v1953_v20, %v1952_v30 }
 0x46d   : > { %v1550_v54 = vmax.f32 %v4140_v29, 0.0  ;;  %v1498_v26 = vadd.f32 %v4070_v51, %v1497_v36 }
 0x46e   : > { %v4152_v28 = vadd.f32 %v1503_v49, %v1169_v39  ;;  %v4253_v49 = vld [vmem:[%s4477_s12] ss:$0 sm:$0xff] }
 0x46f   : > { %v4156_v41 = vadd.f32 %v1498_v26, %v1168_v53  ;;  %v2908_v56 = vpop.f32.mrb[44].mxu0  ;;  %2956 = vmatprep.mubr.f32.mxu1 %v1550_v54 }
 0x470   : > { %v1513_v57 = vadd.f32 %v2908_v56, %v4070_v51  ;;  %v1507_v42 = vpop.f32.mrb[45].mxu0  ;;  %2957 = vmatmul.mubr.f32.gmra.mrb[40].mxu1 %v1551_v33  ;;  %v1553_v39 = vmax.f32 %v4152_v28, 0.0 }
 0x471   : > { %v1552_v48 = vmax.f32 %v4156_v41, 0.0  ;;  %v1508_v32 = vadd.f32 %v4070_v51, %v1507_v42 }
 0x472   : > { %v4168_v34 = vadd.f32 %v1513_v57, %v1171_v45 }
 0x473   : > { %v4172_v53 = vadd.f32 %v1508_v32, %v1170_v58  ;;  %v2911_v50 = vpop.f32.mrb[46].mxu0  ;;  %2959 = vmatprep.mubr.f32.mxu1 %v1552_v48 }
 0x474   : > { %v1523_v52 = vadd.f32 %v2911_v50, %v4070_v51  ;;  %v1517_v62 = vpop.f32.mrb[47].mxu0  ;;  %2960 = vmatmul.mubr.f32.gmra.mrb[42].mxu1 %v1553_v39  ;;  %v1555_v45 = vmax.f32 %v4168_v34, 0.0 }
 0x475   : > { %v1554_v19 = vmax.f32 %v4172_v53, 0.0  ;;  %v1518_v38 = vadd.f32 %v4070_v51, %v1517_v62 }
 0x476   : > { %v4184_v40 = vadd.f32 %v1523_v52, %v1173_v55  ;;  %v1942_v55 = vld [vmem:[%s4480_s15] sm:$0xff] }
 0x477   : > { %v4188_v58 = vadd.f32 %v1518_v38, %v1172_v59  ;;  %2962 = vmatprep.mubr.f32.mxu1 %v1554_v19  ;;  %v3276_v59 = vpack.c.bf16 %v1757_v46, %v1756_v44  ;;  %v3280_v11 = vpack.c.bf16 %v1943_v9, %v1942_v55 }
 0x478   : > { %2963 = vmatmul.mubr.f32.gmra.mrb[44].mxu1 %v1555_v45  ;;  %v1557_v51 = vmax.f32 %v4184_v40, 0.0 }
 0x479   : > { %v1556_v63 = vmax.f32 %v4188_v58, 0.0  ;;  %3277 = vmatprep.subr.bf16.mxu0 %v3276_v59  ;;  %3312 = vmatprep.subr.bf16.mxu1 %v3280_v11 }
 0x47a   : > { %3279 = vmatpush3.bf16.msra.mxu0 %v3276_v59  ;;  %3320 = vmatpush3.bf16.msra.mxu1 %v3280_v11 }
 0x47b   : > { %2965 = vmatprep.mubr.f32.mxu1 %v1556_v63  ;;  %3281 = vmatprep.subr.bf16.mxu0 %v3280_v11 }
 0x47c   : > { %2966 = vmatmul.mubr.f32.gmra.mrb[46].mxu1 %v1557_v51  ;;  %3313 = vmatprep.subr.bf16.mxu1 %v3284_v61 }
 0x47e   : > { %3321 = vmatpush3.bf16.msra.mxu1 %v3284_v61 }
 0x47f   : > { %3314 = vmatprep.subr.bf16.mxu1 %v3288_v3 }
 0x482   : > { %3322 = vmatpush3.bf16.msra.mxu1 %v3288_v3 }
 0x483   : > { %3315 = vmatprep.subr.bf16.mxu1 %v3292_v25 }
 0x486   : > { %3323 = vmatpush3.bf16.msra.mxu1 %v3292_v25 }
 0x487   : > { %3316 = vmatprep.subr.bf16.mxu1 %v4236_v37 }
 0x48a   : > { %3324 = vmatpush3.bf16.msra.mxu1 %v4236_v37 }
 0x48b   : > { %3317 = vmatprep.subr.bf16.mxu1 %v4245_v47 }
 0x48e   : > { %3325 = vmatpush3.bf16.msra.mxu1 %v4245_v47 }
 0x533   : > { %v2946_v36 = vpop.f32.mrb[32].mxu1 }
 0x534   : > { %v1653_v26 = vadd.f32 %v2946_v36, %v4253_v49  ;;  %v1647_v56 = vpop.f32.mrb[33].mxu1 }
 0x535   : > { %v1648_v57 = vadd.f32 %v4253_v49, %v1647_v56 }
 0x536   : > { %v1727_v50 = vmax.f32 %v1653_v26, 0.0 }
 0x537   : > { %v1726_v42 = vmax.f32 %v1648_v57, 0.0  ;;  %v2949_v32 = vpop.f32.mrb[34].mxu1 }
 0x538   : > { %v1663_v52 = vadd.f32 %v2949_v32, %v4253_v49  ;;  %v1657_v62 = vpop.f32.mrb[35].mxu1 }
 0x539   : > { %v1658_v38 = vadd.f32 %v4253_v49, %v1657_v62  ;;  %3000 = vmatprep.mubr.f32.mxu0 %v1726_v42 }
 0x53a   : > { %3001 = vmatmul.mubr.f32.vlgmr.msra.gmra.mrb[48].mxu0 %v1727_v50  ;;  %v1729_v59 = vmax.f32 %v1663_v52, 0.0 }
 0x53b   : > { %v1728_v44 = vmax.f32 %v1658_v38, 0.0  ;;  %v2952_v46 = vpop.f32.mrb[36].mxu1  ;;  %3283 = vmatpush3.bf16.msra.mxu0 %v3280_v11 }
 0x53c   : > { %v1673_v55 = vadd.f32 %v2952_v46, %v4253_v49  ;;  %v1667_v9 = vpop.f32.mrb[37].mxu1  ;;  %3285 = vmatprep.subr.bf16.mxu0 %v3284_v61 }
 0x53d   : > { %v1668_v35 = vadd.f32 %v4253_v49, %v1667_v9  ;;  %3003 = vmatprep.mubr.f32.mxu0 %v1728_v44 }
 0x53e   : > { %3004 = vmatmul.mubr.f32.gmra.mrb[50].mxu0 %v1729_v59  ;;  %v1731_v2 = vmax.f32 %v1673_v55, 0.0 }
 0x53f   : > { %v1730_v5 = vmax.f32 %v1668_v35, 0.0  ;;  %v2955_v0 = vpop.f32.mrb[38].mxu1  ;;  %3287 = vmatpush3.bf16.msra.mxu0 %v3284_v61 }
 0x540   : > { %v1683_v16 = vadd.f32 %v2955_v0, %v4253_v49  ;;  %v1677_v23 = vpop.f32.mrb[39].mxu1  ;;  %3289 = vmatprep.subr.bf16.mxu0 %v3288_v3 }
 0x541   : > { %v1678_v14 = vadd.f32 %v4253_v49, %v1677_v23  ;;  %3006 = vmatprep.mubr.f32.mxu0 %v1730_v5  ;;  %v1957_v23 = vld [vmem:[%s4480_s15 + $0x78] sm:$0xff] }
 0x542   : > { %3007 = vmatmul.mubr.f32.gmra.mrb[52].mxu0 %v1731_v2  ;;  %v1733_v30 = vmax.f32 %v1683_v16, 0.0  ;;  %v1954_v2 = vld [vmem:[%s4480_s15 + $0x60] sm:$0xff] }
 0x543   : > { %v1732_v11 = vmax.f32 %v1678_v14, 0.0  ;;  %v2958_v31 = vpop.f32.mrb[40].mxu1  ;;  %3291 = vmatpush3.bf16.msra.mxu0 %v3288_v3 }
 0x544   : > { %v1693_v20 = vadd.f32 %v2958_v31, %v4253_v49  ;;  %v1687_v36 = vpop.f32.mrb[41].mxu1  ;;  %3293 = vmatprep.subr.bf16.mxu0 %v3292_v25 }
 0x545   : > { %v1688_v26 = vadd.f32 %v4253_v49, %v1687_v36  ;;  %3009 = vmatprep.mubr.f32.mxu0 %v1732_v11  ;;  %v4290_v11 = vld [vmem:[%s4479_s14] ss:$0 sm:$0xff] }
 0x546   : > { %3010 = vmatmul.mubr.f32.gmra.mrb[54].mxu0 %v1733_v30  ;;  %v1735_v57 = vmax.f32 %v1693_v20, 0.0 }
 0x547   : > { %v1734_v61 = vmax.f32 %v1688_v26, 0.0  ;;  %v2961_v56 = vpop.f32.mrb[42].mxu1  ;;  %3295 = vmatpush3.bf16.msra.mxu0 %v3292_v25 }
 0x548   : > { %v1703_v42 = vadd.f32 %v2961_v56, %v4253_v49  ;;  %v1697_v32 = vpop.f32.mrb[43].mxu1  ;;  %3297 = vmatprep.subr.bf16.mxu0 %v4236_v37 }
 0x549   : > { %v1698_v3 = vadd.f32 %v4253_v49, %v1697_v32  ;;  %3012 = vmatprep.mubr.f32.mxu0 %v1734_v61 }
 0x54a   : > { %3013 = vmatmul.mubr.f32.gmra.mrb[56].mxu0 %v1735_v57  ;;  %v1737_v62 = vmax.f32 %v1703_v42, 0.0 }
 0x54b   : > { %v1736_v50 = vmax.f32 %v1698_v3, 0.0  ;;  %v2964_v52 = vpop.f32.mrb[44].mxu1  ;;  %3299 = vmatpush3.bf16.msra.mxu0 %v4236_v37 }
 0x54c   : > { %v1713_v38 = vadd.f32 %v2964_v52, %v4253_v49  ;;  %v1707_v44 = vpop.f32.mrb[45].mxu1  ;;  %3301 = vmatprep.subr.bf16.mxu0 %v4245_v47 }
 0x54d   : > { %v1708_v25 = vadd.f32 %v4253_v49, %v1707_v44  ;;  %3015 = vmatprep.mubr.f32.mxu0 %v1736_v50 }
 0x54e   : > { %3016 = vmatmul.mubr.f32.gmra.mrb[58].mxu0 %v1737_v62  ;;  %v1739_v55 = vmax.f32 %v1713_v38, 0.0 }
 0x54f   : > { %v1738_v46 = vmax.f32 %v1708_v25, 0.0  ;;  %v2967_v59 = vpop.f32.mrb[46].mxu1  ;;  %3303 = vmatpush3.bf16.msra.mxu0 %v4245_v47  ;;  %v1955_v47 = vld [vmem:[%s4480_s15 + $0x68] sm:$0xff] }
 0x550   : > { %v1723_v9 = vadd.f32 %v2967_v59, %v4253_v49  ;;  %v1717_v35 = vpop.f32.mrb[47].mxu1  ;;  %v3304_v16 = vpack.c.bf16 %v1955_v47, %v1954_v2 }
 0x551   : > { %v1718_v37 = vadd.f32 %v4253_v49, %v1717_v35  ;;  %3018 = vmatprep.mubr.f32.mxu0 %v1738_v46  ;;  %v1956_v49 = vld [vmem:[%s4480_s15 + $0x70] sm:$0xff] }
 0x552   : > { %3019 = vmatmul.mubr.f32.gmra.mrb[60].mxu0 %v1739_v55  ;;  %v1741_v0 = vmax.f32 %v1723_v9, 0.0  ;;  %3305 = vmatprep.subr.bf16.mxu0 %v3304_v16  ;;  %v3308_v14 = vpack.c.bf16 %v1957_v23, %v1956_v49 }
 0x553   : > { %v1740_v5 = vmax.f32 %v1718_v37, 0.0  ;;  %3318 = vmatprep.subr.bf16.mxu1 %v3304_v16  ;;  %3307 = vmatpush3.bf16.msra.mxu0 %v3304_v16 }
 0x554   : > { %3326 = vmatpush3.bf16.msra.mxu1 %v3304_v16  ;;  %3309 = vmatprep.subr.bf16.mxu0 %v3308_v14 }
 0x555   : > { %3021 = vmatprep.mubr.f32.mxu0 %v1740_v5  ;;  %3319 = vmatprep.subr.bf16.mxu1 %v3308_v14 }
 0x556   : > { %3022 = vmatmul.mubr.f32.gmra.mrb[62].mxu0 %v1741_v0 }
 0x557   : > { %3311 = vmatpush3.bf16.msra.mxu0 %v3308_v14 }
 0x558   : > { %3327 = vmatpush3.bf16.msra.mxu1 %v3308_v14 }
 0x60d   : > { %v3002_v31 = vpop.f32.mrb[48].mxu0 }
 0x60e   : > { %v1837_v30 = vadd.f32 %v3002_v31, %v4290_v11  ;;  %v1831_v20 = vpop.f32.mrb[49].mxu0 }
 0x60f   : > { %v1832_v36 = vadd.f32 %v4290_v11, %v1831_v20 }
 0x610   : > { %v1911_v26 = vadd.f32 %v1837_v30, %v1543_v7 }
 0x611   : > { %v1910_v61 = vadd.f32 %v1832_v36, %v1542_v12  ;;  %v3005_v56 = vpop.f32.mrb[50].mxu0 }
 0x612   : > { %v1847_v57 = vadd.f32 %v3005_v56, %v4290_v11  ;;  %v1841_v42 = vpop.f32.mrb[51].mxu0  ;;  %v1927_v50 = vmax.f32 %v1911_v26, 0.0 }
 0x613   : > { %v1926_v32 = vmax.f32 %v1910_v61, 0.0  ;;  %v1842_v3 = vadd.f32 %v4290_v11, %v1841_v42 }
 0x614   : > { %v1913_v52 = vadd.f32 %v1847_v57, %v1545_v17 }
 0x615   : > { %v1912_v62 = vadd.f32 %v1842_v3, %v1544_v18  ;;  %v3008_v38 = vpop.f32.mrb[52].mxu0  ;;  %3056 = vmatprep.mubr.f32.mxu0 %v1926_v32 }
 0x616   : > { %v1857_v1 = vadd.f32 %v3008_v38, %v4290_v11  ;;  %v1851_v8 = vpop.f32.mrb[53].mxu0  ;;  %3057 = vmatmul.mubr.f32.vlgmr.msra.gmra.mrb[64].mxu0 %v1927_v50  ;;  %v1929_v44 = vmax.f32 %v1913_v52, 0.0 }
 0x617   : > { %v1928_v12 = vmax.f32 %v1912_v62, 0.0  ;;  %v1852_v7 = vadd.f32 %v4290_v11, %v1851_v8 }
 0x618   : > { %v1915_v25 = vadd.f32 %v1857_v1, %v1547_v21 }
 0x619   : > { %v1914_v10 = vadd.f32 %v1852_v7, %v1546_v24  ;;  %v3011_v17 = vpop.f32.mrb[54].mxu0  ;;  %3059 = vmatprep.mubr.f32.mxu0 %v1928_v12 }
 0x61a   : > { %v1867_v60 = vadd.f32 %v3011_v17, %v4290_v11  ;;  %v1861_v18 = vpop.f32.mrb[55].mxu0  ;;  %3060 = vmatmul.mubr.f32.gmra.mrb[66].mxu0 %v1929_v44  ;;  %v1931_v55 = vmax.f32 %v1915_v25, 0.0 }
 0x61b   : > { %v1930_v46 = vmax.f32 %v1914_v10, 0.0  ;;  %v1862_v59 = vadd.f32 %v4290_v11, %v1861_v18 }
 0x61c   : > { %v1917_v9 = vadd.f32 %v1867_v60, %v1549_v27 }
 0x61d   : > { %v1916_v6 = vadd.f32 %v1862_v59, %v1548_v43  ;;  %v3014_v21 = vpop.f32.mrb[56].mxu0  ;;  %3062 = vmatprep.mubr.f32.mxu1 %v1930_v46 }
 0x61e   : > { %v1877_v4 = vadd.f32 %v3014_v21, %v4290_v11  ;;  %v1871_v24 = vpop.f32.mrb[57].mxu0  ;;  %3063 = vmatmul.mubr.f32.vlgmr.msra.gmra.mrb[48].mxu1 %v1931_v55  ;;  %v1933_v5 = vmax.f32 %v1917_v9, 0.0 }
 0x61f   : > { %v1932_v35 = vmax.f32 %v1916_v6, 0.0  ;;  %v1872_v37 = vadd.f32 %v4290_v11, %v1871_v24 }
 0x620   : > { %v1919_v0 = vadd.f32 %v1877_v4, %v1551_v33 }
 0x621   : > { %v1918_v15 = vadd.f32 %v1872_v37, %v1550_v54  ;;  %v3017_v27 = vpop.f32.mrb[58].mxu0  ;;  %3065 = vmatprep.mubr.f32.mxu1 %v1932_v35 }
 0x622   : > { %v1887_v13 = vadd.f32 %v3017_v27, %v4290_v11  ;;  %v1881_v43 = vpop.f32.mrb[59].mxu0  ;;  %3066 = vmatmul.mubr.f32.gmra.mrb[50].mxu1 %v1933_v5  ;;  %v1935_v16 = vmax.f32 %v1919_v0, 0.0 }
 0x623   : > { %v1934_v2 = vmax.f32 %v1918_v15, 0.0  ;;  %v1882_v47 = vadd.f32 %v4290_v11, %v1881_v43 }
 0x624   : > { %v1921_v49 = vadd.f32 %v1887_v13, %v1553_v39 }
 0x625   : > { %v1920_v22 = vadd.f32 %v1882_v47, %v1552_v48  ;;  %v3020_v33 = vpop.f32.mrb[60].mxu0  ;;  %3068 = vmatprep.mubr.f32.mxu1 %v1934_v2 }
 0x626   : > { %v1897_v29 = vadd.f32 %v3020_v33, %v4290_v11  ;;  %v1891_v54 = vpop.f32.mrb[61].mxu0  ;;  %3069 = vmatmul.mubr.f32.gmra.mrb[52].mxu1 %v1935_v16  ;;  %v1937_v31 = vmax.f32 %v1921_v49, 0.0 }
 0x627   : > { %v1936_v23 = vmax.f32 %v1920_v22, 0.0  ;;  %v1892_v14 = vadd.f32 %v4290_v11, %v1891_v54 }
 0x628   : > { %v1923_v30 = vadd.f32 %v1897_v29, %v1555_v45  ;;  %v2406_v45 = vld [vmem:[%s4481_s16] ss:$0 sm:$0xff] }
 0x629   : > { %v1922_v28 = vadd.f32 %v1892_v14, %v1554_v19  ;;  %v3023_v39 = vpop.f32.mrb[62].mxu0  ;;  %3071 = vmatprep.mubr.f32.mxu1 %v1936_v23 }
 0x62a   : > { %v1907_v41 = vadd.f32 %v3023_v39, %v4290_v11  ;;  %v1901_v48 = vpop.f32.mrb[63].mxu0  ;;  %3072 = vmatmul.mubr.f32.gmra.mrb[54].mxu1 %v1937_v31  ;;  %v1939_v26 = vmax.f32 %v1923_v30, 0.0 }
 0x62b   : > { %v1938_v20 = vmax.f32 %v1922_v28, 0.0  ;;  %v1902_v36 = vadd.f32 %v4290_v11, %v1901_v48 }
 0x62c   : > { %v1925_v61 = vadd.f32 %v1907_v41, %v1557_v51 }
 0x62d   : > { %v1924_v34 = vadd.f32 %v1902_v36, %v1556_v63  ;;  %3074 = vmatprep.mubr.f32.mxu1 %v1938_v20 }
 0x62e   : > { %3075 = vmatmul.mubr.f32.gmra.mrb[56].mxu1 %v1939_v26  ;;  %v1941_v19 = vmax.f32 %v1925_v61, 0.0 }
 0x62f   : > { %v1940_v53 = vmax.f32 %v1924_v34, 0.0 }
 0x631   : > { %3077 = vmatprep.mubr.f32.mxu1 %v1940_v53 }
 0x632   : > { %3078 = vmatmul.mubr.f32.gmra.mrb[58].mxu1 %v1941_v19 }
 0x6e9   : > { %v3058_v56 = vpop.f32.mrb[64].mxu0 }
 0x6ea   : > { %v2037_v57 = vadd.f32 %v3058_v56, %v2406_v45  ;;  %v2031_v11 = vpop.f32.mrb[65].mxu0 }
 0x6eb   : > { %v2032_v40 = vadd.f32 %v2406_v45, %v2031_v11 }
 0x6ec   : > { %2112 = vmax.xlane.f32.xlu0 %v2037_v57 }
 0x6ed   : > { %v3061_v42 = vpop.f32.mrb[66].mxu0 }
 0x6ee   : > { %v2047_v51 = vadd.f32 %v3061_v42, %v2406_v45  ;;  %v2041_v32 = vpop.f32.mrb[67].mxu0 }
 0x6ef   : > { %v2042_v63 = vadd.f32 %v2406_v45, %v2041_v32 }
 0x6f0   : > { %2116 = vmax.xlane.f32.xlu1 %v2047_v51  ;;  %2110 = vmax.xlane.f32.xlu0 %v2032_v40 }
 0x6f1   : > { %v3064_v58 = vpop.f32.mrb[48].mxu1 }
 0x6f2   : > { %v2051_v3 = vpop.f32.mrb[49].mxu1  ;;  %v2057_v62 = vadd.f32 %v3064_v58, %v2406_v45 }
 0x6f3   : > { %v2052_v50 = vadd.f32 %v2406_v45, %v2051_v3 }
 0x6f4   : > { %2114 = vmax.xlane.f32.xlu1 %v2042_v63 }
 0x6f5   : > { %v3067_v52 = vpop.f32.mrb[50].mxu1  ;;  %2118 = vmax.xlane.f32.xlu0 %v2052_v50 }
 0x6f6   : > { %v2061_v38 = vpop.f32.mrb[51].mxu1  ;;  %v2067_v12 = vadd.f32 %v3067_v52, %v2406_v45 }
 0x6f7   : > { %v2062_v1 = vadd.f32 %v2406_v45, %v2061_v38 }
 0x6f8   : > { %2120 = vmax.xlane.f32.xlu1 %v2057_v62 }
 0x6f9   : > { %v3070_v8 = vpop.f32.mrb[52].mxu1  ;;  %2122 = vmax.xlane.f32.xlu0 %v2062_v1 }
 0x6fa   : > { %v2071_v7 = vpop.f32.mrb[53].mxu1  ;;  %v4346_v10 = vadd.f32 %v3070_v8, %v2406_v45 }
 0x6fb   : > { %v4343_v44 = vadd.f32 %v2406_v45, %v2071_v7 }
 0x6fc   : > { %2124 = vmax.xlane.f32.xlu1 %v2067_v12 }
 0x6fd   : > { %v3073_v25 = vpop.f32.mrb[54].mxu1  ;;  %2126 = vmax.xlane.f32.xlu0 %v4343_v44 }
 0x6fe   : > { %v2081_v17 = vpop.f32.mrb[55].mxu1  ;;  %v4352_v46 = vadd.f32 %v3073_v25, %v2406_v45 }
 0x6ff   : > { %v4348_v60 = vadd.f32 %v2406_v45, %v2081_v17 }
 0x700   : > { %2128 = vmax.xlane.f32.xlu1 %v4346_v10 }
 0x701   : > { %v3076_v18 = vpop.f32.mrb[56].mxu1  ;;  %2130 = vmax.xlane.f32.xlu0 %v4348_v60 }
 0x702   : > { %v2091_v59 = vpop.f32.mrb[57].mxu1  ;;  %v4358_v6 = vadd.f32 %v3076_v18, %v2406_v45 }
 0x703   : > { %v4354_v55 = vadd.f32 %v2406_v45, %v2091_v59 }
 0x704   : > { %2132 = vmax.xlane.f32.xlu1 %v4352_v46 }
 0x705   : > { %v3079_v9 = vpop.f32.mrb[58].mxu1  ;;  %2134 = vmax.xlane.f32.xlu0 %v4354_v55 }
 0x706   : > { %v2101_v21 = vpop.f32.mrb[59].mxu1  ;;  %v4364_v24 = vadd.f32 %v3079_v9, %v2406_v45 }
 0x707   : > { %v4360_v4 = vadd.f32 %v2406_v45, %v2101_v21 }
 0x708   : > { %2136 = vmax.xlane.f32.xlu1 %v4358_v6 }
 0x709   : > { %2138 = vmax.xlane.f32.xlu0 %v4360_v4 }
 0x70c   : > { %2140 = vmax.xlane.f32.xlu1 %v4364_v24 }
 0x779   : > { %v2113_v35 = vpop.xlane.xlu0 %2112 }
 0x77a   : > { %v2143_v37 = vsub.f32 %v2037_v57, %v2113_v35 }
 0x77c   : > { %v2160_v5 = vmul.f32 1.442695, %v2143_v37 }
 0x77d   : > { %v2117_v0 = vpop.xlane.xlu1 %2116  ;;  %v2111_v15 = vpop.xlane.xlu0 %2110 }
 0x77e   : > { %3336 = vpow2.f32 %v2160_v5  ;;  %v2145_v27 = vsub.f32 %v2047_v51, %v2117_v0  ;;  %v2142_v13 = vsub.f32 %v2032_v40, %v2111_v15 }
 0x780   : > { %v2164_v43 = vmul.f32 1.442695, %v2145_v27  ;;  %v2158_v2 = vmul.f32 1.442695, %v2142_v13 }
 0x781   : > { %v2115_v47 = vpop.xlane.xlu1 %2114 }
 0x782   : > { %3338 = vpow2.f32 %v2164_v43  ;;  %v2144_v16 = vsub.f32 %v2042_v63, %v2115_v47  ;;  %v2119_v49 = vpop.xlane.xlu0 %2118 }
 0x783   : > { %3340 = vpow2.f32 %v2158_v2  ;;  %v2146_v22 = vsub.f32 %v2052_v50, %v2119_v49 }
 0x784   : > { %v2162_v33 = vmul.f32 1.442695, %v2144_v16 }
 0x785   : > { %v2121_v29 = vpop.xlane.xlu1 %2120  ;;  %v2166_v14 = vmul.f32 1.442695, %v2146_v22 }
 0x786   : > { %3342 = vpow2.f32 %v2162_v33  ;;  %v2147_v54 = vsub.f32 %v2057_v62, %v2121_v29  ;;  %v2123_v23 = vpop.xlane.xlu0 %2122 }
 0x787   : > { %v2148_v31 = vsub.f32 %v2062_v1, %v2123_v23 }
 0x788   : > { %v4367_v30 = vpop.eup %3336  ;;  %v2168_v28 = vmul.f32 1.442695, %v2147_v54 }
 0x789   : > { %2192 = vadd.xlane.f32.xlu1 %v4367_v30  ;;  %v2125_v39 = vpop.xlane.xlu1 %2124  ;;  %v2170_v20 = vmul.f32 1.442695, %v2148_v31 }
 0x78a   : > { %3344 = vpow2.f32 %v2168_v28  ;;  %v2149_v41 = vsub.f32 %v2067_v12, %v2125_v39  ;;  %v2127_v48 = vpop.xlane.xlu0 %2126 }
 0x78b   : > { %3346 = vpow2.f32 %v2166_v14  ;;  %v2150_v36 = vsub.f32 %v4343_v44, %v2127_v48 }
 0x78c   : > { %v4371_v26 = vpop.eup %3338  ;;  %v2172_v61 = vmul.f32 1.442695, %v2149_v41 }
 0x78d   : > { %v4373_v34 = vpop.eup %3340  ;;  %2196 = vadd.xlane.f32.xlu1 %v4371_v26  ;;  %v2129_v53 = vpop.xlane.xlu1 %2128  ;;  %v2174_v56 = vmul.f32 1.442695, %v2150_v36 }
 0x78e   : > { %3348 = vpow2.f32 %v2172_v61  ;;  %v2151_v19 = vsub.f32 %v4346_v10, %v2129_v53  ;;  %2190 = vadd.xlane.f32.xlu0 %v4373_v34  ;;  %v2131_v45 = vpop.xlane.xlu0 %2130 }
 0x78f   : > { %3350 = vpow2.f32 %v2170_v20  ;;  %v2152_v57 = vsub.f32 %v4348_v60, %v2131_v45 }
 0x790   : > { %v4379_v11 = vpop.eup %3342  ;;  %v2176_v42 = vmul.f32 1.442695, %v2151_v19 }
 0x791   : > { %v2133_v40 = vpop.xlane.xlu1 %2132  ;;  %v2178_v58 = vmul.f32 1.442695, %v2152_v57 }
 0x792   : > { %3352 = vpow2.f32 %v2176_v42  ;;  %v2153_v51 = vsub.f32 %v4352_v46, %v2133_v40  ;;  %2194 = vadd.xlane.f32.xlu0 %v4379_v11  ;;  %v2135_v32 = vpop.xlane.xlu0 %2134 }
 0x793   : > { %3354 = vpow2.f32 %v2174_v56  ;;  %v2154_v63 = vsub.f32 %v4354_v55, %v2135_v32 }
 0x794   : > { %v4384_v3 = vpop.eup %3344  ;;  %v2180_v50 = vmul.f32 1.442695, %v2153_v51 }
 0x795   : > { %v4386_v52 = vpop.eup %3346  ;;  %2200 = vadd.xlane.f32.xlu1 %v4384_v3  ;;  %v2137_v62 = vpop.xlane.xlu1 %2136  ;;  %v2182_v8 = vmul.f32 1.442695, %v2154_v63 }
 0x796   : > { %3356 = vpow2.f32 %v2180_v50  ;;  %v2155_v38 = vsub.f32 %v4358_v6, %v2137_v62  ;;  %2198 = vadd.xlane.f32.xlu0 %v4386_v52  ;;  %v2139_v1 = vpop.xlane.xlu0 %2138 }
 0x797   : > { %3358 = vpow2.f32 %v2178_v58  ;;  %v2156_v12 = vsub.f32 %v4360_v4, %v2139_v1 }
 0x798   : > { %v4392_v7 = vpop.eup %3348  ;;  %v2184_v44 = vmul.f32 1.442695, %v2155_v38 }
 0x799   : > { %v4394_v25 = vpop.eup %3350  ;;  %2204 = vadd.xlane.f32.xlu1 %v4392_v7  ;;  %v2141_v10 = vpop.xlane.xlu1 %2140  ;;  %v2186_v60 = vmul.f32 1.442695, %v2156_v12 }
 0x79a   : > { %3360 = vpow2.f32 %v2184_v44  ;;  %v2157_v17 = vsub.f32 %v4364_v24, %v2141_v10  ;;  %2202 = vadd.xlane.f32.xlu0 %v4394_v25 }
 0x79b   : > { %3362 = vpow2.f32 %v2182_v8 }
 0x79c   : > { %v4399_v18 = vpop.eup %3352  ;;  %v2188_v46 = vmul.f32 1.442695, %v2157_v17 }
 0x79d   : > { %v4401_v59 = vpop.eup %3354  ;;  %2208 = vadd.xlane.f32.xlu1 %v4399_v18 }
 0x79e   : > { %3364 = vpow2.f32 %v2188_v46  ;;  %2206 = vadd.xlane.f32.xlu0 %v4401_v59 }
 0x79f   : > { %3366 = vpow2.f32 %v2186_v60 }
 0x7a0   : > { %v4405_v55 = vpop.eup %3356 }
 0x7a1   : > { %v4407_v9 = vpop.eup %3358  ;;  %2212 = vadd.xlane.f32.xlu1 %v4405_v55 }
 0x7a2   : > { %2210 = vadd.xlane.f32.xlu0 %v4407_v9 }
 0x7a4   : > { %v4411_v6 = vpop.eup %3360 }
 0x7a5   : > { %v4413_v21 = vpop.eup %3362  ;;  %2216 = vadd.xlane.f32.xlu1 %v4411_v6 }
 0x7a6   : > { %2214 = vadd.xlane.f32.xlu0 %v4413_v21 }
 0x7a8   : > { %v4417_v4 = vpop.eup %3364 }
 0x7a9   : > { %v4419_v24 = vpop.eup %3366  ;;  %2220 = vadd.xlane.f32.xlu1 %v4417_v4 }
 0x7aa   : > { %2218 = vadd.xlane.f32.xlu0 %v4419_v24 }
 0x816   : > { %v2193_v35 = vpop.xlane.xlu1 %2192 }
 0x817   : > { %3368 = vrcp.f32 %v2193_v35 }
 0x81a   : > { %v2197_v37 = vpop.xlane.xlu1 %2196 }
 0x81b   : > { %3370 = vrcp.f32 %v2197_v37  ;;  %v2191_v5 = vpop.xlane.xlu0 %2190 }
 0x81c   : > { %3372 = vrcp.f32 %v2191_v5 }
 0x81f   : > { %v2195_v0 = vpop.xlane.xlu0 %2194 }
 0x820   : > { %3374 = vrcp.f32 %v2195_v0 }
 0x821   : > { %v3369_v15 = vpop.eup %3368 }
 0x822   : > { %v2239_v27 = vmul.f32 %v3369_v15, %v2193_v35  ;;  %v2201_v13 = vpop.xlane.xlu1 %2200 }
 0x823   : > { %3376 = vrcp.f32 %v2201_v13  ;;  %v2199_v43 = vpop.xlane.xlu0 %2198 }
 0x824   : > { %v2255_v2 = vsub.f32 2.0, %v2239_v27  ;;  %3378 = vrcp.f32 %v2199_v43 }
 0x825   : > { %v3371_v47 = vpop.eup %3370 }
 0x826   : > { %v3373_v16 = vpop.eup %3372  ;;  %v2271_v49 = vmul.f32 %v3369_v15, %v2255_v2  ;;  %v2241_v22 = vmul.f32 %v3371_v47, %v2197_v37  ;;  %v2205_v33 = vpop.xlane.xlu1 %2204 }
 0x827   : > { %v2238_v29 = vmul.f32 %v3373_v16, %v2191_v5  ;;  %3380 = vrcp.f32 %v2205_v33  ;;  %v2203_v54 = vpop.xlane.xlu0 %2202 }
 0x828   : > { %v2287_v23 = vmul.f32 %v4367_v30, %v2271_v49  ;;  %v2257_v14 = vsub.f32 2.0, %v2241_v22  ;;  %3382 = vrcp.f32 %v2203_v54 }
 0x829   : > { %v2254_v31 = vsub.f32 2.0, %v2238_v29 }
 0x82a   : > { %v3375_v28 = vpop.eup %3374  ;;  %2303 = vst [vmem:[%s4428_s30 + $0x8] sm:$0xff] %v2287_v23  ;;  %v2273_v39 = vmul.f32 %v3371_v47, %v2257_v14  ;;  %v2209_v41 = vpop.xlane.xlu1 %2208 }
 0x82b   : > { %v2270_v48 = vmul.f32 %v3373_v16, %v2254_v31  ;;  %v2240_v20 = vmul.f32 %v3375_v28, %v2195_v0  ;;  %3384 = vrcp.f32 %v2209_v41  ;;  %v2207_v36 = vpop.xlane.xlu0 %2206 }
 0x82c   : > { %v2289_v61 = vmul.f32 %v4371_v26, %v2273_v39  ;;  %3386 = vrcp.f32 %v2207_v36 }
 0x82d   : > { %v3377_v53 = vpop.eup %3376  ;;  %v2286_v19 = vmul.f32 %v4373_v34, %v2270_v48  ;;  %v2256_v30 = vsub.f32 2.0, %v2240_v20 }
 0x82e   : > { %v3379_v45 = vpop.eup %3378  ;;  %2305 = vst [vmem:[%s4428_s30 + $0x18] sm:$0xff] %v2289_v61  ;;  %v2243_v56 = vmul.f32 %v3377_v53, %v2201_v13  ;;  %v2213_v57 = vpop.xlane.xlu1 %2212 }
 0x82f   : > { %2302 = vst [vmem:[%s4428_s30] sm:$0xff] %v2286_v19  ;;  %v2272_v42 = vmul.f32 %v3375_v28, %v2256_v30  ;;  %v2242_v40 = vmul.f32 %v3379_v45, %v2199_v43  ;;  %3388 = vrcp.f32 %v2213_v57  ;;  %v2211_v51 = vpop.xlane.xlu0 %2210 }
 0x830   : > { %v2259_v32 = vsub.f32 2.0, %v2243_v56  ;;  %3390 = vrcp.f32 %v2211_v51 }
 0x831   : > { %v3381_v58 = vpop.eup %3380  ;;  %v2288_v26 = vmul.f32 %v4379_v11, %v2272_v42  ;;  %v2258_v63 = vsub.f32 2.0, %v2242_v40 }
 0x832   : > { %v3383_v50 = vpop.eup %3382  ;;  %v2275_v34 = vmul.f32 %v3377_v53, %v2259_v32  ;;  %v2245_v62 = vmul.f32 %v3381_v58, %v2205_v33  ;;  %v2217_v38 = vpop.xlane.xlu1 %2216 }
 0x833   : > { %2304 = vst [vmem:[%s4428_s30 + $0x10] sm:$0xff] %v2288_v26  ;;  %v2274_v1 = vmul.f32 %v3379_v45, %v2258_v63  ;;  %v2244_v8 = vmul.f32 %v3383_v50, %v2203_v54  ;;  %3392 = vrcp.f32 %v2217_v38  ;;  %v2215_v12 = vpop.xlane.xlu0 %2214 }
 0x834   : > { %v2291_v44 = vmul.f32 %v4384_v3, %v2275_v34  ;;  %v2261_v10 = vsub.f32 2.0, %v2245_v62  ;;  %3394 = vrcp.f32 %v2215_v12 }
 0x835   : > { %v3385_v17 = vpop.eup %3384  ;;  %v2290_v60 = vmul.f32 %v4386_v52, %v2274_v1  ;;  %v2260_v11 = vsub.f32 2.0, %v2244_v8 }
 0x836   : > { %v3387_v46 = vpop.eup %3386  ;;  %2307 = vst [vmem:[%s4428_s30 + $0x28] sm:$0xff] %v2291_v44  ;;  %v2277_v35 = vmul.f32 %v3381_v58, %v2261_v10  ;;  %v2247_v37 = vmul.f32 %v3385_v17, %v2209_v41  ;;  %v2221_v5 = vpop.xlane.xlu1 %2220 }
 0x837   : > { %2306 = vst [vmem:[%s4428_s30 + $0x20] sm:$0xff] %v2290_v60  ;;  %v2276_v0 = vmul.f32 %v3383_v50, %v2260_v11  ;;  %v2246_v15 = vmul.f32 %v3387_v46, %v2207_v36  ;;  %3396 = vrcp.f32 %v2221_v5  ;;  %v2219_v27 = vpop.xlane.xlu0 %2218 }
 0x838   : > { %v2293_v3 = vmul.f32 %v4392_v7, %v2277_v35  ;;  %v2263_v13 = vsub.f32 2.0, %v2247_v37  ;;  %3398 = vrcp.f32 %v2219_v27 }
 0x839   : > { %v3389_v43 = vpop.eup %3388  ;;  %v2292_v52 = vmul.f32 %v4394_v25, %v2276_v0  ;;  %v2262_v2 = vsub.f32 2.0, %v2246_v15 }
 0x83a   : > { %v3391_v47 = vpop.eup %3390  ;;  %2309 = vst [vmem:[%s4428_s30 + $0x38] sm:$0xff] %v2293_v3  ;;  %v2279_v16 = vmul.f32 %v3385_v17, %v2263_v13  ;;  %v2249_v49 = vmul.f32 %v3389_v43, %v2213_v57 }
 0x83b   : > { %2308 = vst [vmem:[%s4428_s30 + $0x30] sm:$0xff] %v2292_v52  ;;  %v2278_v22 = vmul.f32 %v3387_v46, %v2262_v2  ;;  %v2248_v33 = vmul.f32 %v3391_v47, %v2211_v51 }
 0x83c   : > { %v2295_v29 = vmul.f32 %v4399_v18, %v2279_v16  ;;  %v2265_v54 = vsub.f32 2.0, %v2249_v49 }
 0x83d   : > { %v3393_v23 = vpop.eup %3392  ;;  %v2294_v7 = vmul.f32 %v4401_v59, %v2278_v22  ;;  %v2264_v14 = vsub.f32 2.0, %v2248_v33 }
 0x83e   : > { %v3395_v31 = vpop.eup %3394  ;;  %2311 = vst [vmem:[%s4428_s30 + $0x48] sm:$0xff] %v2295_v29  ;;  %v2281_v25 = vmul.f32 %v3389_v43, %v2265_v54  ;;  %v2251_v28 = vmul.f32 %v3393_v23, %v2217_v38 }
 0x83f   : > { %2310 = vst [vmem:[%s4428_s30 + $0x40] sm:$0xff] %v2294_v7  ;;  %v2280_v39 = vmul.f32 %v3391_v47, %v2264_v14  ;;  %v2250_v41 = vmul.f32 %v3395_v31, %v2215_v12 }
 0x840   : > { %v2297_v48 = vmul.f32 %v4405_v55, %v2281_v25  ;;  %v2267_v20 = vsub.f32 2.0, %v2251_v28 }
 0x841   : > { %v3397_v36 = vpop.eup %3396  ;;  %v2296_v18 = vmul.f32 %v4407_v9, %v2280_v39  ;;  %v2266_v61 = vsub.f32 2.0, %v2250_v41 }
 0x842   : > { %v3399_v53 = vpop.eup %3398  ;;  %2313 = vst [vmem:[%s4428_s30 + $0x58] sm:$0xff] %v2297_v48  ;;  %v2283_v59 = vmul.f32 %v3393_v23, %v2267_v20  ;;  %v2253_v19 = vmul.f32 %v3397_v36, %v2221_v5 }
 0x843   : > { %2312 = vst [vmem:[%s4428_s30 + $0x50] sm:$0xff] %v2296_v18  ;;  %v2282_v30 = vmul.f32 %v3395_v31, %v2266_v61  ;;  %v2252_v45 = vmul.f32 %v3399_v53, %v2219_v27 }
 0x844   : > { %v2299_v56 = vmul.f32 %v4411_v6, %v2283_v59  ;;  %v2269_v57 = vsub.f32 2.0, %v2253_v19 }
 0x845   : > { %v2298_v55 = vmul.f32 %v4413_v21, %v2282_v30  ;;  %v2268_v42 = vsub.f32 2.0, %v2252_v45 }
 0x846   : > { %2315 = vst [vmem:[%s4428_s30 + $0x68] sm:$0xff] %v2299_v56  ;;  %v2285_v40 = vmul.f32 %v3397_v36, %v2269_v57 }
 0x847   : > { %2314 = vst [vmem:[%s4428_s30 + $0x60] sm:$0xff] %v2298_v55  ;;  %v2284_v9 = vmul.f32 %v3399_v53, %v2268_v42 }
 0x848   : > { %v2301_v51 = vmul.f32 %v4417_v4, %v2285_v40 }
 0x849   : > { %v2300_v32 = vmul.f32 %v4419_v24, %v2284_v9 }
 0x84a   : > { %2317 = vst [vmem:[%s4428_s30 + $0x78] sm:$0xff] %v2301_v51 }
 0x84b   : > { %2316 = vst [vmem:[%s4428_s30 + $0x70] sm:$0xff] %v2300_v32 }
 0x84c PF: > { %s27_s24 = sadd.s32 1, %s3406_s24  }
 0x84d   : > { %p24_p4 = scmp.ge.s32.totalorder %s27_s24, 4  }
 0x84f   :  { %26 = sbr.rel (!%p24_p4) target bundleno = 3 (0x3), region = 118 }

</bundles_post_ra>
